<compile_context>
chip_gen: v5e
topology: v5e:2x2
jax: 0.10.0
libtpu: 0.0.40
codegen_flags: <defaults>
</compile_context>

<pallas_src>
import jax
import jax.numpy as jnp
from jax import lax
from jax.experimental import pallas as pl
from jax.experimental.pallas import tpu as pltpu

STATE_SIZE = 32
ACTION_SIZE = 4
H1, H2, HG = 256, 128, 64   # fc1 out, fc2 out (= GRU input), GRU hidden (true)
HGP = 128                   # lane-padded GRU hidden (gate blocks 128-aligned)
B = 8                       # batch == GRU sequence length after unsqueeze(0)
NEG_INF = -1e30


def policy_kernel(x_ref, w1_ref, b1_ref, w2_ref, b2_ref,
                  wih_ref, bih_ref, whh_ref, bhh_ref,
                  wa_ref, ba_ref, w3_ref, b3_ref,
                  out_ref, gru_scr):
    # ---- fc1 + relu : (B, S) @ (S, 256) ----
    h1 = jnp.dot(x_ref[...], w1_ref[...], preferred_element_type=jnp.float32)
    h1 = jnp.maximum(h1 + b1_ref[...], 0.0)

    # ---- fc2 + relu : (B, 256) @ (256, 128), stays in vregs ----
    h2 = jnp.dot(h1, w2_ref[...], preferred_element_type=jnp.float32)
    h2 = jnp.maximum(h2 + b2_ref[...], 0.0)

    # ---- hoisted GRU input projection: (B, 128) @ (128, 384) once ----
    gi_all = jnp.dot(h2, wih_ref[...],
                     preferred_element_type=jnp.float32) + bih_ref[...]

    # ---- GRU (batch=1, seq=B), PyTorch gate order r, z, n ----
    # Gates are padded to 128-lane blocks; padded lanes stay exactly zero.
    whh = whh_ref[...]          # (128, 384), hoisted out of the loop
    bhh = bhh_ref[...]          # (1, 384)
    T = gru_scr.shape[0]        # sequence length (= B), compile-time constant

    h = jnp.zeros((1, HGP), jnp.float32)
    for t in range(T):          # full static unroll
        gi = gi_all[t:t + 1, :]                                       # (1, 384)
        gh = jnp.dot(h, whh, preferred_element_type=jnp.float32) + bhh
        r = jax.nn.sigmoid(gi[:, 0:HGP] + gh[:, 0:HGP])
        z = jax.nn.sigmoid(gi[:, HGP:2 * HGP] + gh[:, HGP:2 * HGP])
        n = jnp.tanh(gi[:, 2 * HGP:3 * HGP] + r * gh[:, 2 * HGP:3 * HGP])
        h = n + z * (h - n)                                           # (1, 128)
        gru_scr[t:t + 1, :] = h

    # ---- attention linear + tanh : (B, 128) @ (128, 128) ----
    a = jnp.dot(gru_scr[...], wa_ref[...], preferred_element_type=jnp.float32)
    a = jnp.tanh(a + ba_ref[...])

    # ---- fc3 + softmax(dim=-1), lane-dense (B, 128) output ----
    logits = jnp.dot(a, w3_ref[...],
                     preferred_element_type=jnp.float32) + b3_ref[...]
    col = lax.broadcasted_iota(jnp.int32, logits.shape, 1)
    logits = jnp.where(col < ACTION_SIZE, logits, NEG_INF)
    m = jnp.max(logits, axis=-1, keepdims=True)
    e = jnp.exp(logits - m)
    out_ref[...] = e / jnp.sum(e, axis=-1, keepdims=True)


def _pad_gate_cols(w):
    """(..., 3*HG) -> (..., 3*HGP): left-align each gate in a 128-lane block."""
    blocks = []
    for g in range(3):
        blk = w[..., g * HG:(g + 1) * HG]
        pad_widths = [(0, 0)] * (w.ndim - 1) + [(0, HGP - HG)]
        blocks.append(jnp.pad(blk, pad_widths))
    return jnp.concatenate(blocks, axis=-1)


def _pack_params(params):
    """Pad GRU / attention / fc3 weights to the lane-aligned kernel layout."""
    (w1, b1, w2, b2, wih, bih, whh, bhh, wa, ba, w3, b3) = params
    wih_p = _pad_gate_cols(wih)                                    # (128, 384)
    bih_p = _pad_gate_cols(bih)                                    # (1, 384)
    whh_p = jnp.pad(_pad_gate_cols(whh), ((0, HGP - HG), (0, 0)))  # (128, 384)
    bhh_p = _pad_gate_cols(bhh)                                    # (1, 384)
    wa_p = jnp.pad(wa, ((0, HGP - HG), (0, HGP - HG)))             # (128, 128)
    ba_p = jnp.pad(ba, ((0, 0), (0, HGP - HG)))                    # (1, 128)
    w3_p = jnp.pad(w3, ((0, HGP - HG), (0, HGP - ACTION_SIZE)))    # (128, 128)
    b3_p = jnp.pad(b3, ((0, 0), (0, HGP - ACTION_SIZE)))           # (1, 128)
    return (w1, b1, w2, b2, wih_p, bih_p, whh_p, bhh_p,
            wa_p, ba_p, w3_p, b3_p)


def policy_forward(x, params):
    packed = _pack_params(params)
    vmem = pl.BlockSpec(memory_space=pltpu.MemorySpace.VMEM)
    out = pl.pallas_call(
        policy_kernel,
        out_shape=jax.ShapeDtypeStruct((x.shape[0], HGP), jnp.float32),
        in_specs=[vmem] * 13,
        out_specs=vmem,
        scratch_shapes=[
            pltpu.VMEM((x.shape[0], HGP), jnp.float32),   # GRU outputs
        ],
    )(x, *packed)
    return out[:, :ACTION_SIZE]


def init_params(key):
    ks = jax.random.split(key, 12)

    def u(k, shape, fan_in):
        bound = 1.0 / jnp.sqrt(fan_in)
        return jax.random.uniform(k, shape, jnp.float32, -bound, bound)

    # Linear weights stored as (in, out); biases as (1, out). True (unpadded).
    w1 = u(ks[0], (STATE_SIZE, H1), STATE_SIZE)
    b1 = u(ks[1], (1, H1), STATE_SIZE)
    w2 = u(ks[2], (H1, H2), H1)
    b2 = u(ks[3], (1, H2), H1)
    # GRU: PyTorch weight_ih (3H, 128), weight_hh (3H, 64) -> transposed.
    wih = u(ks[4], (H2, 3 * HG), HG)
    bih = u(ks[5], (1, 3 * HG), HG)
    whh = u(ks[6], (HG, 3 * HG), HG)
    bhh = u(ks[7], (1, 3 * HG), HG)
    wa = u(ks[8], (HG, HG), HG)
    ba = u(ks[9], (1, HG), HG)
    w3 = u(ks[10], (HG, ACTION_SIZE), HG)
    b3 = u(ks[11], (1, ACTION_SIZE), HG)
    return (w1, b1, w2, b2, wih, bih, whh, bhh, wa, ba, w3, b3)


def policy_ref(x, params):
    """Pure-JAX reference identical to the PyTorch forward (unpadded)."""
    (w1, b1, w2, b2, wih, bih, whh, bhh, wa, ba, w3, b3) = params
    h = jnp.maximum(x @ w1 + b1, 0.0)
    h = jnp.maximum(h @ w2 + b2, 0.0)

    def step(h_prev, x_t):
        gi = x_t[None, :] @ wih + bih
        gh = h_prev @ whh + bhh
        r = jax.nn.sigmoid(gi[:, :HG] + gh[:, :HG])
        z = jax.nn.sigmoid(gi[:, HG:2 * HG] + gh[:, HG:2 * HG])
        n = jnp.tanh(gi[:, 2 * HG:] + r * gh[:, 2 * HG:])
        h_new = (1.0 - z) * n + z * h_prev
        return h_new, h_new[0]

    _, gru_out = lax.scan(step, jnp.zeros((1, HG), jnp.float32), h)
    a = jnp.tanh(gru_out @ wa + ba)
    logits = a @ w3 + b3
    return jax.nn.softmax(logits, axis=-1)


if __name__ == "__main__":
    key = jax.random.PRNGKey(0)
    k_x, k_p = jax.random.split(key)
    x = jax.random.normal(k_x, (B, STATE_SIZE), jnp.float32)
    params = init_params(k_p)

    out = policy_forward(x, params)
    out = jax.block_until_ready(out)

    ref = policy_ref(x, params)
    assert out.shape == (B, ACTION_SIZE)
    assert jnp.allclose(jnp.sum(out, axis=-1), 1.0, atol=1e-5)
    assert jnp.allclose(out, ref, atol=1e-5, rtol=1e-5)
    print("KERNEL_OK")
</pallas_src>

<mosaic_0001>
module attributes {stable_mosaic.version = 11 : i64} {
  func.func @policy_kernel(%arg0: memref<8x32xf32, #tpu.memory_space<vmem>>, %arg1: memref<32x256xf32, #tpu.memory_space<vmem>>, %arg2: memref<1x256xf32, #tpu.memory_space<vmem>>, %arg3: memref<256x128xf32, #tpu.memory_space<vmem>>, %arg4: memref<1x128xf32, #tpu.memory_space<vmem>>, %arg5: memref<128x384xf32, #tpu.memory_space<vmem>>, %arg6: memref<1x384xf32, #tpu.memory_space<vmem>>, %arg7: memref<128x384xf32, #tpu.memory_space<vmem>>, %arg8: memref<1x384xf32, #tpu.memory_space<vmem>>, %arg9: memref<128x128xf32, #tpu.memory_space<vmem>>, %arg10: memref<1x128xf32, #tpu.memory_space<vmem>>, %arg11: memref<128x128xf32, #tpu.memory_space<vmem>>, %arg12: memref<1x128xf32, #tpu.memory_space<vmem>>, %arg13: memref<8x128xf32, #tpu.memory_space<vmem>>, %arg14: memref<8x128xf32, #tpu.memory_space<vmem>>) attributes {dimension_semantics = [], scalar_prefetch = 0 : i64, scratch_operands = 1 : i64, tpu.core_type = #tpu.core_type<tc>} {
    %c0 = arith.constant 0 : index
    %c0_0 = arith.constant 0 : index
    %0 = vector.load %arg0[%c0, %c0_0] : memref<8x32xf32, #tpu.memory_space<vmem>>, vector<8x32xf32>
    %c0_1 = arith.constant 0 : index
    %c0_2 = arith.constant 0 : index
    %1 = vector.load %arg1[%c0_1, %c0_2] : memref<32x256xf32, #tpu.memory_space<vmem>>, vector<32x256xf32>
    %cst = arith.constant dense<0.000000e+00> : vector<8x256xf32>
    %2 = tpu.matmul %0, %1, %cst {dimension_numbers = #tpu.dot_dimension_numbers<[1], [0], [0], [1], [0, 0, 1, 1], [], []>} : vector<8x32xf32>, vector<32x256xf32>, vector<8x256xf32> -> vector<8x256xf32>
    %c0_3 = arith.constant 0 : index
    %c0_4 = arith.constant 0 : index
    %3 = vector.load %arg2[%c0_3, %c0_4] : memref<1x256xf32, #tpu.memory_space<vmem>>, vector<1x256xf32>
    %4 = vector.broadcast %3 : vector<1x256xf32> to vector<8x256xf32>
    %5 = arith.addf %2, %4 : vector<8x256xf32>
    %cst_5 = arith.constant 0.000000e+00 : f32
    %6 = vector.broadcast %cst_5 : f32 to vector<8x256xf32>
    %7 = arith.maximumf %5, %6 : vector<8x256xf32>
    %c0_6 = arith.constant 0 : index
    %c0_7 = arith.constant 0 : index
    %8 = vector.load %arg3[%c0_6, %c0_7] : memref<256x128xf32, #tpu.memory_space<vmem>>, vector<256x128xf32>
    %cst_8 = arith.constant dense<0.000000e+00> : vector<8x128xf32>
    %9 = tpu.matmul %7, %8, %cst_8 {dimension_numbers = #tpu.dot_dimension_numbers<[1], [0], [0], [1], [0, 0, 1, 1], [], []>} : vector<8x256xf32>, vector<256x128xf32>, vector<8x128xf32> -> vector<8x128xf32>
    %c0_9 = arith.constant 0 : index
    %c0_10 = arith.constant 0 : index
    %10 = vector.load %arg4[%c0_9, %c0_10] : memref<1x128xf32, #tpu.memory_space<vmem>>, vector<1x128xf32>
    %11 = vector.broadcast %10 : vector<1x128xf32> to vector<8x128xf32>
    %12 = arith.addf %9, %11 : vector<8x128xf32>
    %cst_11 = arith.constant 0.000000e+00 : f32
    %13 = vector.broadcast %cst_11 : f32 to vector<8x128xf32>
    %14 = arith.maximumf %12, %13 : vector<8x128xf32>
    %c0_12 = arith.constant 0 : index
    %c0_13 = arith.constant 0 : index
    %15 = vector.load %arg5[%c0_12, %c0_13] : memref<128x384xf32, #tpu.memory_space<vmem>>, vector<128x384xf32>
    %cst_14 = arith.constant dense<0.000000e+00> : vector<8x384xf32>
    %16 = tpu.matmul %14, %15, %cst_14 {dimension_numbers = #tpu.dot_dimension_numbers<[1], [0], [0], [1], [0, 0, 1, 1], [], []>} : vector<8x128xf32>, vector<128x384xf32>, vector<8x384xf32> -> vector<8x384xf32>
    %c0_15 = arith.constant 0 : index
    %c0_16 = arith.constant 0 : index
    %17 = vector.load %arg6[%c0_15, %c0_16] : memref<1x384xf32, #tpu.memory_space<vmem>>, vector<1x384xf32>
    %18 = vector.broadcast %17 : vector<1x384xf32> to vector<8x384xf32>
    %19 = arith.addf %16, %18 : vector<8x384xf32>
    %c0_17 = arith.constant 0 : index
    %c0_18 = arith.constant 0 : index
    %20 = vector.load %arg7[%c0_17, %c0_18] : memref<128x384xf32, #tpu.memory_space<vmem>>, vector<128x384xf32>
    %c0_19 = arith.constant 0 : index
    %c0_20 = arith.constant 0 : index
    %21 = vector.load %arg8[%c0_19, %c0_20] : memref<1x384xf32, #tpu.memory_space<vmem>>, vector<1x384xf32>
    %cst_21 = arith.constant 0.000000e+00 : f32
    %22 = vector.broadcast %cst_21 : f32 to vector<1x128xf32>
    %23 = vector.extract_strided_slice %19 {offsets = [0, 0], sizes = [1, 384], strides = [1, 1]} : vector<8x384xf32> to vector<1x384xf32>
    %cst_22 = arith.constant dense<0.000000e+00> : vector<1x384xf32>
    %24 = tpu.matmul %22, %20, %cst_22 {dimension_numbers = #tpu.dot_dimension_numbers<[1], [0], [0], [1], [0, 0, 1, 1], [], []>} : vector<1x128xf32>, vector<128x384xf32>, vector<1x384xf32> -> vector<1x384xf32>
    %25 = arith.addf %24, %21 : vector<1x384xf32>
    %26 = vector.extract_strided_slice %23 {offsets = [0, 0], sizes = [1, 128], strides = [1, 1]} : vector<1x384xf32> to vector<1x128xf32>
    %27 = vector.extract_strided_slice %25 {offsets = [0, 0], sizes = [1, 128], strides = [1, 1]} : vector<1x384xf32> to vector<1x128xf32>
    %28 = arith.addf %26, %27 : vector<1x128xf32>
    %29 = arith.negf %28 : vector<1x128xf32>
    %30 = math.exp %29 : vector<1x128xf32>
    %cst_23 = arith.constant 1.000000e+00 : f32
    %31 = vector.broadcast %cst_23 : f32 to vector<1x128xf32>
    %32 = arith.addf %31, %30 : vector<1x128xf32>
    %33 = arith.divf %31, %32 : vector<1x128xf32>
    %34 = vector.extract_strided_slice %23 {offsets = [0, 128], sizes = [1, 128], strides = [1, 1]} : vector<1x384xf32> to vector<1x128xf32>
    %35 = vector.extract_strided_slice %25 {offsets = [0, 128], sizes = [1, 128], strides = [1, 1]} : vector<1x384xf32> to vector<1x128xf32>
    %36 = arith.addf %34, %35 : vector<1x128xf32>
    %37 = arith.negf %36 : vector<1x128xf32>
    %38 = math.exp %37 : vector<1x128xf32>
    %cst_24 = arith.constant 1.000000e+00 : f32
    %39 = vector.broadcast %cst_24 : f32 to vector<1x128xf32>
    %40 = arith.addf %39, %38 : vector<1x128xf32>
    %41 = arith.divf %39, %40 : vector<1x128xf32>
    %42 = vector.extract_strided_slice %23 {offsets = [0, 256], sizes = [1, 128], strides = [1, 1]} : vector<1x384xf32> to vector<1x128xf32>
    %43 = vector.extract_strided_slice %25 {offsets = [0, 256], sizes = [1, 128], strides = [1, 1]} : vector<1x384xf32> to vector<1x128xf32>
    %44 = arith.mulf %33, %43 : vector<1x128xf32>
    %45 = arith.addf %42, %44 : vector<1x128xf32>
    %46 = math.tanh %45 : vector<1x128xf32>
    %47 = arith.subf %22, %46 : vector<1x128xf32>
    %48 = arith.mulf %41, %47 : vector<1x128xf32>
    %49 = arith.addf %46, %48 : vector<1x128xf32>
    %c0_25 = arith.constant 0 : index
    %c0_26 = arith.constant 0 : index
    %50 = vector.load %arg14[%c0_25, %c0_26] : memref<8x128xf32, #tpu.memory_space<vmem>>, vector<1x128xf32>
    tpu.vector_store %arg14[%c0_25, %c0_26], %49 {strides = array<i32>} : memref<8x128xf32, #tpu.memory_space<vmem>>, vector<1x128xf32>,
    %51 = vector.extract_strided_slice %19 {offsets = [1, 0], sizes = [1, 384], strides = [1, 1]} : vector<8x384xf32> to vector<1x384xf32>
    %cst_27 = arith.constant dense<0.000000e+00> : vector<1x384xf32>
    %52 = tpu.matmul %49, %20, %cst_27 {dimension_numbers = #tpu.dot_dimension_numbers<[1], [0], [0], [1], [0, 0, 1, 1], [], []>} : vector<1x128xf32>, vector<128x384xf32>, vector<1x384xf32> -> vector<1x384xf32>
    %53 = arith.addf %52, %21 : vector<1x384xf32>
    %54 = vector.extract_strided_slice %51 {offsets = [0, 0], sizes = [1, 128], strides = [1, 1]} : vector<1x384xf32> to vector<1x128xf32>
    %55 = vector.extract_strided_slice %53 {offsets = [0, 0], sizes = [1, 128], strides = [1, 1]} : vector<1x384xf32> to vector<1x128xf32>
    %56 = arith.addf %54, %55 : vector<1x128xf32>
    %57 = arith.negf %56 : vector<1x128xf32>
    %58 = math.exp %57 : vector<1x128xf32>
    %cst_28 = arith.constant 1.000000e+00 : f32
    %59 = vector.broadcast %cst_28 : f32 to vector<1x128xf32>
    %60 = arith.addf %59, %58 : vector<1x128xf32>
    %61 = arith.divf %59, %60 : vector<1x128xf32>
    %62 = vector.extract_strided_slice %51 {offsets = [0, 128], sizes = [1, 128], strides = [1, 1]} : vector<1x384xf32> to vector<1x128xf32>
    %63 = vector.extract_strided_slice %53 {offsets = [0, 128], sizes = [1, 128], strides = [1, 1]} : vector<1x384xf32> to vector<1x128xf32>
    %64 = arith.addf %62, %63 : vector<1x128xf32>
    %65 = arith.negf %64 : vector<1x128xf32>
    %66 = math.exp %65 : vector<1x128xf32>
    %cst_29 = arith.constant 1.000000e+00 : f32
    %67 = vector.broadcast %cst_29 : f32 to vector<1x128xf32>
    %68 = arith.addf %67, %66 : vector<1x128xf32>
    %69 = arith.divf %67, %68 : vector<1x128xf32>
    %70 = vector.extract_strided_slice %51 {offsets = [0, 256], sizes = [1, 128], strides = [1, 1]} : vector<1x384xf32> to vector<1x128xf32>
    %71 = vector.extract_strided_slice %53 {offsets = [0, 256], sizes = [1, 128], strides = [1, 1]} : vector<1x384xf32> to vector<1x128xf32>
    %72 = arith.mulf %61, %71 : vector<1x128xf32>
    %73 = arith.addf %70, %72 : vector<1x128xf32>
    %74 = math.tanh %73 : vector<1x128xf32>
    %75 = arith.subf %49, %74 : vector<1x128xf32>
    %76 = arith.mulf %69, %75 : vector<1x128xf32>
    %77 = arith.addf %74, %76 : vector<1x128xf32>
    %c1 = arith.constant 1 : index
    %c0_30 = arith.constant 0 : index
    %78 = vector.load %arg14[%c1, %c0_30] : memref<8x128xf32, #tpu.memory_space<vmem>>, vector<1x128xf32>
    tpu.vector_store %arg14[%c1, %c0_30], %77 {strides = array<i32>} : memref<8x128xf32, #tpu.memory_space<vmem>>, vector<1x128xf32>,
    %79 = vector.extract_strided_slice %19 {offsets = [2, 0], sizes = [1, 384], strides = [1, 1]} : vector<8x384xf32> to vector<1x384xf32>
    %cst_31 = arith.constant dense<0.000000e+00> : vector<1x384xf32>
    %80 = tpu.matmul %77, %20, %cst_31 {dimension_numbers = #tpu.dot_dimension_numbers<[1], [0], [0], [1], [0, 0, 1, 1], [], []>} : vector<1x128xf32>, vector<128x384xf32>, vector<1x384xf32> -> vector<1x384xf32>
    %81 = arith.addf %80, %21 : vector<1x384xf32>
    %82 = vector.extract_strided_slice %79 {offsets = [0, 0], sizes = [1, 128], strides = [1, 1]} : vector<1x384xf32> to vector<1x128xf32>
    %83 = vector.extract_strided_slice %81 {offsets = [0, 0], sizes = [1, 128], strides = [1, 1]} : vector<1x384xf32> to vector<1x128xf32>
    %84 = arith.addf %82, %83 : vector<1x128xf32>
    %85 = arith.negf %84 : vector<1x128xf32>
    %86 = math.exp %85 : vector<1x128xf32>
    %cst_32 = arith.constant 1.000000e+00 : f32
    %87 = vector.broadcast %cst_32 : f32 to vector<1x128xf32>
    %88 = arith.addf %87, %86 : vector<1x128xf32>
    %89 = arith.divf %87, %88 : vector<1x128xf32>
    %90 = vector.extract_strided_slice %79 {offsets = [0, 128], sizes = [1, 128], strides = [1, 1]} : vector<1x384xf32> to vector<1x128xf32>
    %91 = vector.extract_strided_slice %81 {offsets = [0, 128], sizes = [1, 128], strides = [1, 1]} : vector<1x384xf32> to vector<1x128xf32>
    %92 = arith.addf %90, %91 : vector<1x128xf32>
    %93 = arith.negf %92 : vector<1x128xf32>
    %94 = math.exp %93 : vector<1x128xf32>
    %cst_33 = arith.constant 1.000000e+00 : f32
    %95 = vector.broadcast %cst_33 : f32 to vector<1x128xf32>
    %96 = arith.addf %95, %94 : vector<1x128xf32>
    %97 = arith.divf %95, %96 : vector<1x128xf32>
    %98 = vector.extract_strided_slice %79 {offsets = [0, 256], sizes = [1, 128], strides = [1, 1]} : vector<1x384xf32> to vector<1x128xf32>
    %99 = vector.extract_strided_slice %81 {offsets = [0, 256], sizes = [1, 128], strides = [1, 1]} : vector<1x384xf32> to vector<1x128xf32>
    %100 = arith.mulf %89, %99 : vector<1x128xf32>
    %101 = arith.addf %98, %100 : vector<1x128xf32>
    %102 = math.tanh %101 : vector<1x128xf32>
    %103 = arith.subf %77, %102 : vector<1x128xf32>
    %104 = arith.mulf %97, %103 : vector<1x128xf32>
    %105 = arith.addf %102, %104 : vector<1x128xf32>
    %c2 = arith.constant 2 : index
    %c0_34 = arith.constant 0 : index
    %106 = vector.load %arg14[%c2, %c0_34] : memref<8x128xf32, #tpu.memory_space<vmem>>, vector<1x128xf32>
    tpu.vector_store %arg14[%c2, %c0_34], %105 {strides = array<i32>} : memref<8x128xf32, #tpu.memory_space<vmem>>, vector<1x128xf32>,
    %107 = vector.extract_strided_slice %19 {offsets = [3, 0], sizes = [1, 384], strides = [1, 1]} : vector<8x384xf32> to vector<1x384xf32>
    %cst_35 = arith.constant dense<0.000000e+00> : vector<1x384xf32>
    %108 = tpu.matmul %105, %20, %cst_35 {dimension_numbers = #tpu.dot_dimension_numbers<[1], [0], [0], [1], [0, 0, 1, 1], [], []>} : vector<1x128xf32>, vector<128x384xf32>, vector<1x384xf32> -> vector<1x384xf32>
    %109 = arith.addf %108, %21 : vector<1x384xf32>
    %110 = vector.extract_strided_slice %107 {offsets = [0, 0], sizes = [1, 128], strides = [1, 1]} : vector<1x384xf32> to vector<1x128xf32>
    %111 = vector.extract_strided_slice %109 {offsets = [0, 0], sizes = [1, 128], strides = [1, 1]} : vector<1x384xf32> to vector<1x128xf32>
    %112 = arith.addf %110, %111 : vector<1x128xf32>
    %113 = arith.negf %112 : vector<1x128xf32>
    %114 = math.exp %113 : vector<1x128xf32>
    %cst_36 = arith.constant 1.000000e+00 : f32
    %115 = vector.broadcast %cst_36 : f32 to vector<1x128xf32>
    %116 = arith.addf %115, %114 : vector<1x128xf32>
    %117 = arith.divf %115, %116 : vector<1x128xf32>
    %118 = vector.extract_strided_slice %107 {offsets = [0, 128], sizes = [1, 128], strides = [1, 1]} : vector<1x384xf32> to vector<1x128xf32>
    %119 = vector.extract_strided_slice %109 {offsets = [0, 128], sizes = [1, 128], strides = [1, 1]} : vector<1x384xf32> to vector<1x128xf32>
    %120 = arith.addf %118, %119 : vector<1x128xf32>
    %121 = arith.negf %120 : vector<1x128xf32>
    %122 = math.exp %121 : vector<1x128xf32>
    %cst_37 = arith.constant 1.000000e+00 : f32
    %123 = vector.broadcast %cst_37 : f32 to vector<1x128xf32>
    %124 = arith.addf %123, %122 : vector<1x128xf32>
    %125 = arith.divf %123, %124 : vector<1x128xf32>
    %126 = vector.extract_strided_slice %107 {offsets = [0, 256], sizes = [1, 128], strides = [1, 1]} : vector<1x384xf32> to vector<1x128xf32>
    %127 = vector.extract_strided_slice %109 {offsets = [0, 256], sizes = [1, 128], strides = [1, 1]} : vector<1x384xf32> to vector<1x128xf32>
    %128 = arith.mulf %117, %127 : vector<1x128xf32>
    %129 = arith.addf %126, %128 : vector<1x128xf32>
    %130 = math.tanh %129 : vector<1x128xf32>
    %131 = arith.subf %105, %130 : vector<1x128xf32>
    %132 = arith.mulf %125, %131 : vector<1x128xf32>
    %133 = arith.addf %130, %132 : vector<1x128xf32>
    %c3 = arith.constant 3 : index
    %c0_38 = arith.constant 0 : index
    %134 = vector.load %arg14[%c3, %c0_38] : memref<8x128xf32, #tpu.memory_space<vmem>>, vector<1x128xf32>
    tpu.vector_store %arg14[%c3, %c0_38], %133 {strides = array<i32>} : memref<8x128xf32, #tpu.memory_space<vmem>>, vector<1x128xf32>,
    %135 = vector.extract_strided_slice %19 {offsets = [4, 0], sizes = [1, 384], strides = [1, 1]} : vector<8x384xf32> to vector<1x384xf32>
    %cst_39 = arith.constant dense<0.000000e+00> : vector<1x384xf32>
    %136 = tpu.matmul %133, %20, %cst_39 {dimension_numbers = #tpu.dot_dimension_numbers<[1], [0], [0], [1], [0, 0, 1, 1], [], []>} : vector<1x128xf32>, vector<128x384xf32>, vector<1x384xf32> -> vector<1x384xf32>
    %137 = arith.addf %136, %21 : vector<1x384xf32>
    %138 = vector.extract_strided_slice %135 {offsets = [0, 0], sizes = [1, 128], strides = [1, 1]} : vector<1x384xf32> to vector<1x128xf32>
    %139 = vector.extract_strided_slice %137 {offsets = [0, 0], sizes = [1, 128], strides = [1, 1]} : vector<1x384xf32> to vector<1x128xf32>
    %140 = arith.addf %138, %139 : vector<1x128xf32>
    %141 = arith.negf %140 : vector<1x128xf32>
    %142 = math.exp %141 : vector<1x128xf32>
    %cst_40 = arith.constant 1.000000e+00 : f32
    %143 = vector.broadcast %cst_40 : f32 to vector<1x128xf32>
    %144 = arith.addf %143, %142 : vector<1x128xf32>
    %145 = arith.divf %143, %144 : vector<1x128xf32>
    %146 = vector.extract_strided_slice %135 {offsets = [0, 128], sizes = [1, 128], strides = [1, 1]} : vector<1x384xf32> to vector<1x128xf32>
    %147 = vector.extract_strided_slice %137 {offsets = [0, 128], sizes = [1, 128], strides = [1, 1]} : vector<1x384xf32> to vector<1x128xf32>
    %148 = arith.addf %146, %147 : vector<1x128xf32>
    %149 = arith.negf %148 : vector<1x128xf32>
    %150 = math.exp %149 : vector<1x128xf32>
    %cst_41 = arith.constant 1.000000e+00 : f32
    %151 = vector.broadcast %cst_41 : f32 to vector<1x128xf32>
    %152 = arith.addf %151, %150 : vector<1x128xf32>
    %153 = arith.divf %151, %152 : vector<1x128xf32>
    %154 = vector.extract_strided_slice %135 {offsets = [0, 256], sizes = [1, 128], strides = [1, 1]} : vector<1x384xf32> to vector<1x128xf32>
    %155 = vector.extract_strided_slice %137 {offsets = [0, 256], sizes = [1, 128], strides = [1, 1]} : vector<1x384xf32> to vector<1x128xf32>
    %156 = arith.mulf %145, %155 : vector<1x128xf32>
    %157 = arith.addf %154, %156 : vector<1x128xf32>
    %158 = math.tanh %157 : vector<1x128xf32>
    %159 = arith.subf %133, %158 : vector<1x128xf32>
    %160 = arith.mulf %153, %159 : vector<1x128xf32>
    %161 = arith.addf %158, %160 : vector<1x128xf32>
    %c4 = arith.constant 4 : index
    %c0_42 = arith.constant 0 : index
    %162 = vector.load %arg14[%c4, %c0_42] : memref<8x128xf32, #tpu.memory_space<vmem>>, vector<1x128xf32>
    tpu.vector_store %arg14[%c4, %c0_42], %161 {strides = array<i32>} : memref<8x128xf32, #tpu.memory_space<vmem>>, vector<1x128xf32>,
    %163 = vector.extract_strided_slice %19 {offsets = [5, 0], sizes = [1, 384], strides = [1, 1]} : vector<8x384xf32> to vector<1x384xf32>
    %cst_43 = arith.constant dense<0.000000e+00> : vector<1x384xf32>
    %164 = tpu.matmul %161, %20, %cst_43 {dimension_numbers = #tpu.dot_dimension_numbers<[1], [0], [0], [1], [0, 0, 1, 1], [], []>} : vector<1x128xf32>, vector<128x384xf32>, vector<1x384xf32> -> vector<1x384xf32>
    %165 = arith.addf %164, %21 : vector<1x384xf32>
    %166 = vector.extract_strided_slice %163 {offsets = [0, 0], sizes = [1, 128], strides = [1, 1]} : vector<1x384xf32> to vector<1x128xf32>
    %167 = vector.extract_strided_slice %165 {offsets = [0, 0], sizes = [1, 128], strides = [1, 1]} : vector<1x384xf32> to vector<1x128xf32>
    %168 = arith.addf %166, %167 : vector<1x128xf32>
    %169 = arith.negf %168 : vector<1x128xf32>
    %170 = math.exp %169 : vector<1x128xf32>
    %cst_44 = arith.constant 1.000000e+00 : f32
    %171 = vector.broadcast %cst_44 : f32 to vector<1x128xf32>
    %172 = arith.addf %171, %170 : vector<1x128xf32>
    %173 = arith.divf %171, %172 : vector<1x128xf32>
    %174 = vector.extract_strided_slice %163 {offsets = [0, 128], sizes = [1, 128], strides = [1, 1]} : vector<1x384xf32> to vector<1x128xf32>
    %175 = vector.extract_strided_slice %165 {offsets = [0, 128], sizes = [1, 128], strides = [1, 1]} : vector<1x384xf32> to vector<1x128xf32>
    %176 = arith.addf %174, %175 : vector<1x128xf32>
    %177 = arith.negf %176 : vector<1x128xf32>
    %178 = math.exp %177 : vector<1x128xf32>
    %cst_45 = arith.constant 1.000000e+00 : f32
    %179 = vector.broadcast %cst_45 : f32 to vector<1x128xf32>
    %180 = arith.addf %179, %178 : vector<1x128xf32>
    %181 = arith.divf %179, %180 : vector<1x128xf32>
    %182 = vector.extract_strided_slice %163 {offsets = [0, 256], sizes = [1, 128], strides = [1, 1]} : vector<1x384xf32> to vector<1x128xf32>
    %183 = vector.extract_strided_slice %165 {offsets = [0, 256], sizes = [1, 128], strides = [1, 1]} : vector<1x384xf32> to vector<1x128xf32>
    %184 = arith.mulf %173, %183 : vector<1x128xf32>
    %185 = arith.addf %182, %184 : vector<1x128xf32>
    %186 = math.tanh %185 : vector<1x128xf32>
    %187 = arith.subf %161, %186 : vector<1x128xf32>
    %188 = arith.mulf %181, %187 : vector<1x128xf32>
    %189 = arith.addf %186, %188 : vector<1x128xf32>
    %c5 = arith.constant 5 : index
    %c0_46 = arith.constant 0 : index
    %190 = vector.load %arg14[%c5, %c0_46] : memref<8x128xf32, #tpu.memory_space<vmem>>, vector<1x128xf32>
    tpu.vector_store %arg14[%c5, %c0_46], %189 {strides = array<i32>} : memref<8x128xf32, #tpu.memory_space<vmem>>, vector<1x128xf32>,
    %191 = vector.extract_strided_slice %19 {offsets = [6, 0], sizes = [1, 384], strides = [1, 1]} : vector<8x384xf32> to vector<1x384xf32>
    %cst_47 = arith.constant dense<0.000000e+00> : vector<1x384xf32>
    %192 = tpu.matmul %189, %20, %cst_47 {dimension_numbers = #tpu.dot_dimension_numbers<[1], [0], [0], [1], [0, 0, 1, 1], [], []>} : vector<1x128xf32>, vector<128x384xf32>, vector<1x384xf32> -> vector<1x384xf32>
    %193 = arith.addf %192, %21 : vector<1x384xf32>
    %194 = vector.extract_strided_slice %191 {offsets = [0, 0], sizes = [1, 128], strides = [1, 1]} : vector<1x384xf32> to vector<1x128xf32>
    %195 = vector.extract_strided_slice %193 {offsets = [0, 0], sizes = [1, 128], strides = [1, 1]} : vector<1x384xf32> to vector<1x128xf32>
    %196 = arith.addf %194, %195 : vector<1x128xf32>
    %197 = arith.negf %196 : vector<1x128xf32>
    %198 = math.exp %197 : vector<1x128xf32>
    %cst_48 = arith.constant 1.000000e+00 : f32
    %199 = vector.broadcast %cst_48 : f32 to vector<1x128xf32>
    %200 = arith.addf %199, %198 : vector<1x128xf32>
    %201 = arith.divf %199, %200 : vector<1x128xf32>
    %202 = vector.extract_strided_slice %191 {offsets = [0, 128], sizes = [1, 128], strides = [1, 1]} : vector<1x384xf32> to vector<1x128xf32>
    %203 = vector.extract_strided_slice %193 {offsets = [0, 128], sizes = [1, 128], strides = [1, 1]} : vector<1x384xf32> to vector<1x128xf32>
    %204 = arith.addf %202, %203 : vector<1x128xf32>
    %205 = arith.negf %204 : vector<1x128xf32>
    %206 = math.exp %205 : vector<1x128xf32>
    %cst_49 = arith.constant 1.000000e+00 : f32
    %207 = vector.broadcast %cst_49 : f32 to vector<1x128xf32>
    %208 = arith.addf %207, %206 : vector<1x128xf32>
    %209 = arith.divf %207, %208 : vector<1x128xf32>
    %210 = vector.extract_strided_slice %191 {offsets = [0, 256], sizes = [1, 128], strides = [1, 1]} : vector<1x384xf32> to vector<1x128xf32>
    %211 = vector.extract_strided_slice %193 {offsets = [0, 256], sizes = [1, 128], strides = [1, 1]} : vector<1x384xf32> to vector<1x128xf32>
    %212 = arith.mulf %201, %211 : vector<1x128xf32>
    %213 = arith.addf %210, %212 : vector<1x128xf32>
    %214 = math.tanh %213 : vector<1x128xf32>
    %215 = arith.subf %189, %214 : vector<1x128xf32>
    %216 = arith.mulf %209, %215 : vector<1x128xf32>
    %217 = arith.addf %214, %216 : vector<1x128xf32>
    %c6 = arith.constant 6 : index
    %c0_50 = arith.constant 0 : index
    %218 = vector.load %arg14[%c6, %c0_50] : memref<8x128xf32, #tpu.memory_space<vmem>>, vector<1x128xf32>
    tpu.vector_store %arg14[%c6, %c0_50], %217 {strides = array<i32>} : memref<8x128xf32, #tpu.memory_space<vmem>>, vector<1x128xf32>,
    %219 = vector.extract_strided_slice %19 {offsets = [7, 0], sizes = [1, 384], strides = [1, 1]} : vector<8x384xf32> to vector<1x384xf32>
    %cst_51 = arith.constant dense<0.000000e+00> : vector<1x384xf32>
    %220 = tpu.matmul %217, %20, %cst_51 {dimension_numbers = #tpu.dot_dimension_numbers<[1], [0], [0], [1], [0, 0, 1, 1], [], []>} : vector<1x128xf32>, vector<128x384xf32>, vector<1x384xf32> -> vector<1x384xf32>
    %221 = arith.addf %220, %21 : vector<1x384xf32>
    %222 = vector.extract_strided_slice %219 {offsets = [0, 0], sizes = [1, 128], strides = [1, 1]} : vector<1x384xf32> to vector<1x128xf32>
    %223 = vector.extract_strided_slice %221 {offsets = [0, 0], sizes = [1, 128], strides = [1, 1]} : vector<1x384xf32> to vector<1x128xf32>
    %224 = arith.addf %222, %223 : vector<1x128xf32>
    %225 = arith.negf %224 : vector<1x128xf32>
    %226 = math.exp %225 : vector<1x128xf32>
    %cst_52 = arith.constant 1.000000e+00 : f32
    %227 = vector.broadcast %cst_52 : f32 to vector<1x128xf32>
    %228 = arith.addf %227, %226 : vector<1x128xf32>
    %229 = arith.divf %227, %228 : vector<1x128xf32>
    %230 = vector.extract_strided_slice %219 {offsets = [0, 128], sizes = [1, 128], strides = [1, 1]} : vector<1x384xf32> to vector<1x128xf32>
    %231 = vector.extract_strided_slice %221 {offsets = [0, 128], sizes = [1, 128], strides = [1, 1]} : vector<1x384xf32> to vector<1x128xf32>
    %232 = arith.addf %230, %231 : vector<1x128xf32>
    %233 = arith.negf %232 : vector<1x128xf32>
    %234 = math.exp %233 : vector<1x128xf32>
    %cst_53 = arith.constant 1.000000e+00 : f32
    %235 = vector.broadcast %cst_53 : f32 to vector<1x128xf32>
    %236 = arith.addf %235, %234 : vector<1x128xf32>
    %237 = arith.divf %235, %236 : vector<1x128xf32>
    %238 = vector.extract_strided_slice %219 {offsets = [0, 256], sizes = [1, 128], strides = [1, 1]} : vector<1x384xf32> to vector<1x128xf32>
    %239 = vector.extract_strided_slice %221 {offsets = [0, 256], sizes = [1, 128], strides = [1, 1]} : vector<1x384xf32> to vector<1x128xf32>
    %240 = arith.mulf %229, %239 : vector<1x128xf32>
    %241 = arith.addf %238, %240 : vector<1x128xf32>
    %242 = math.tanh %241 : vector<1x128xf32>
    %243 = arith.subf %217, %242 : vector<1x128xf32>
    %244 = arith.mulf %237, %243 : vector<1x128xf32>
    %245 = arith.addf %242, %244 : vector<1x128xf32>
    %c7 = arith.constant 7 : index
    %c0_54 = arith.constant 0 : index
    %246 = vector.load %arg14[%c7, %c0_54] : memref<8x128xf32, #tpu.memory_space<vmem>>, vector<1x128xf32>
    tpu.vector_store %arg14[%c7, %c0_54], %245 {strides = array<i32>} : memref<8x128xf32, #tpu.memory_space<vmem>>, vector<1x128xf32>,
    %c0_55 = arith.constant 0 : index
    %c0_56 = arith.constant 0 : index
    %247 = vector.load %arg14[%c0_55, %c0_56] : memref<8x128xf32, #tpu.memory_space<vmem>>, vector<8x128xf32>
    %c0_57 = arith.constant 0 : index
    %c0_58 = arith.constant 0 : index
    %248 = vector.load %arg9[%c0_57, %c0_58] : memref<128x128xf32, #tpu.memory_space<vmem>>, vector<128x128xf32>
    %cst_59 = arith.constant dense<0.000000e+00> : vector<8x128xf32>
    %249 = tpu.matmul %247, %248, %cst_59 {dimension_numbers = #tpu.dot_dimension_numbers<[1], [0], [0], [1], [0, 0, 1, 1], [], []>} : vector<8x128xf32>, vector<128x128xf32>, vector<8x128xf32> -> vector<8x128xf32>
    %c0_60 = arith.constant 0 : index
    %c0_61 = arith.constant 0 : index
    %250 = vector.load %arg10[%c0_60, %c0_61] : memref<1x128xf32, #tpu.memory_space<vmem>>, vector<1x128xf32>
    %251 = vector.broadcast %250 : vector<1x128xf32> to vector<8x128xf32>
    %252 = arith.addf %249, %251 : vector<8x128xf32>
    %253 = math.tanh %252 : vector<8x128xf32>
    %c0_62 = arith.constant 0 : index
    %c0_63 = arith.constant 0 : index
    %254 = vector.load %arg11[%c0_62, %c0_63] : memref<128x128xf32, #tpu.memory_space<vmem>>, vector<128x128xf32>
    %cst_64 = arith.constant dense<0.000000e+00> : vector<8x128xf32>
    %255 = tpu.matmul %253, %254, %cst_64 {dimension_numbers = #tpu.dot_dimension_numbers<[1], [0], [0], [1], [0, 0, 1, 1], [], []>} : vector<8x128xf32>, vector<128x128xf32>, vector<8x128xf32> -> vector<8x128xf32>
    %c0_65 = arith.constant 0 : index
    %c0_66 = arith.constant 0 : index
    %256 = vector.load %arg12[%c0_65, %c0_66] : memref<1x128xf32, #tpu.memory_space<vmem>>, vector<1x128xf32>
    %257 = vector.broadcast %256 : vector<1x128xf32> to vector<8x128xf32>
    %258 = arith.addf %255, %257 : vector<8x128xf32>
    %259 = tpu.iota {dimensions = array<i32: 1>} : vector<8x128xi32>
    %c4_i32 = arith.constant 4 : i32
    %260 = vector.broadcast %c4_i32 : i32 to vector<8x128xi32>
    %261 = arith.cmpi slt, %259, %260 : vector<8x128xi32>
    %cst_67 = arith.constant -1.000000e+30 : f32
    %262 = vector.broadcast %cst_67 : f32 to vector<8x128xf32>
    %263 = arith.select %261, %258, %262 : vector<8x128xi1>, vector<8x128xf32>
    %cst_68 = arith.constant dense<0xFF800000> : vector<8xf32>
    %264 = vector.multi_reduction <maximumf>, %263, %cst_68 [1] : vector<8x128xf32> to vector<8xf32>
    %265 = vector.shape_cast %264 : vector<8xf32> to vector<8x1xf32>
    %266 = vector.broadcast %265 : vector<8x1xf32> to vector<8x128xf32>
    %267 = arith.subf %263, %266 : vector<8x128xf32>
    %268 = math.exp %267 : vector<8x128xf32>
    %cst_69 = arith.constant dense<0.000000e+00> : vector<8xf32>
    %269 = vector.multi_reduction <add>, %268, %cst_69 [1] : vector<8x128xf32> to vector<8xf32>
    %270 = vector.shape_cast %269 : vector<8xf32> to vector<8x1xf32>
    %271 = vector.broadcast %270 : vector<8x1xf32> to vector<8x128xf32>
    %272 = arith.divf %268, %271 : vector<8x128xf32>
    %c0_70 = arith.constant 0 : index
    %c0_71 = arith.constant 0 : index
    %273 = vector.load %arg13[%c0_70, %c0_71] : memref<8x128xf32, #tpu.memory_space<vmem>>, vector<8x128xf32>
    tpu.vector_store %arg13[%c0_70, %c0_71], %272 {strides = array<i32>} : memref<8x128xf32, #tpu.memory_space<vmem>>, vector<8x128xf32>,
    return
  }
}

</mosaic_0001>

<bundles_post_ra>
// kernel: tpu_custom_call.1
= control target key start
LH: loop header
LB: loop body
LE: loop exit
PB: predicated region body
PF: predicated region fallthrough
CT: control target
= control target key end

     0   :  { %18 = vsyncpa [#allocation4], 0  ;;  %s2831_s0 = inlined_call_operand.hbm [shape: f32[8,32], index: 0, kind: input, shape index: {}]   ;;  %s2832_s1 = inlined_call_operand.hbm [shape: f32[32,256], index: 1, kind: input, shape index: {}]   ;;  %s2833_s2 = inlined_call_operand.hbm [shape: f32[1,256], index: 2, kind: input, shape index: {}]   ;;  %s2834_s3 = inlined_call_operand.hbm [shape: f32[256,128], index: 3, kind: input, shape index: {}]   ;;  %s2835_s4 = inlined_call_operand.hbm [shape: f32[1,128], index: 4, kind: input, shape index: {}]   ;;  %s2836_s5 = inlined_call_operand.hbm [shape: f32[128,384], index: 5, kind: input, shape index: {}]   ;;  %s2837_s6 = inlined_call_operand.vmem [shape: f32[1,384], index: 6, kind: input, shape index: {}]   ;;  %s2838_s7 = inlined_call_operand.hbm [shape: f32[128,384], index: 7, kind: input, shape index: {}]   ;;  %s2839_s8 = inlined_call_operand.vmem [shape: f32[1,384], index: 8, kind: input, shape index: {}]   ;;  %s2840_s9 = inlined_call_operand.hbm [shape: f32[128,128], index: 9, kind: input, shape index: {}]   ;;  %s2841_s10 = inlined_call_operand.vmem [shape: f32[1,128], index: 10, kind: input, shape index: {}]   ;;  %s2842_s11 = inlined_call_operand.hbm [shape: f32[128,128], index: 11, kind: input, shape index: {}]   ;;  %s2843_s12 = inlined_call_operand.vmem [shape: f32[1,128], index: 12, kind: input, shape index: {}]   ;;  %s2844_s13 = inlined_call_operand.hbm [shape: f32[8,128], index: 13, kind: output, shape index: {}]  }
   0x1   :  { %19 = vsyncpa [#allocation7], 0 }
   0x2   :  { %20 = vsyncpa [#allocation10], 0 }
   0x3   :  { %21 = vsyncpa [#allocation13], 0 }
   0x4   :  { %22 = vsyncpa [#allocation16], 0  ;;  %s39_s27 = sshll.u32 %s2832_s1, 4  ;;  %s40_s27 = int_to_ptr.hbm [resolvable:$true] %s39_s27 }
   0x5   :  { %23 = vsyncpa [#allocation5], 0  ;;  %s2022_s28 = smov [#allocation6]   ;;  %s63_s15 = sshll.u32 %s2834_s3, 4  ;;  %s64_s15 = int_to_ptr.hbm [resolvable:$true] %s63_s15 }
   0x6   :  { %s41_s29 = sshll.u32 %s2022_s28, 4  ;;  %s2023_s16 = smov 256   ;;  %s42_s29 = int_to_ptr.vmem [resolvable:$true] %s41_s29 }
   0x7   :  { %s2024_s17 = smov 16   ;;  %s2025_s18 = smov [#allocation9]  }
   0x8   :  { %47 = dma.hbm_to_vmem [thread:$0]  %s40_s27, 1024, %s42_s29, [#allocation7], %s2023_s16, %s2023_s16, %s2024_s17  }
   0x9   :  { %s65_s19 = sshll.u32 %s2025_s18, 4  ;;  %s2026_s20 = smov 128   ;;  %s66_s19 = int_to_ptr.vmem [resolvable:$true] %s65_s19 }
   0xa   :  { %s2027_s21 = smov 8   ;;  %s87_s23 = sshll.u32 %s2836_s5, 4  ;;  %s88_s23 = int_to_ptr.hbm [resolvable:$true] %s87_s23 }
   0xb   :  { %71 = dma.hbm_to_vmem [thread:$0]  %s64_s15, 4096, %s66_s19, [#allocation10], %s2026_s20, %s2026_s20, %s2027_s21  }
   0xc   :  { %s2028_s24 = smov [#allocation12]   ;;  %s117_s27 = sshll.u32 %s2840_s9, 4  ;;  %s118_s27 = int_to_ptr.hbm [resolvable:$true] %s117_s27 }
   0xd   :  { %s89_s3 = sshll.u32 %s2028_s24, 4  ;;  %s2029_s28 = smov 384   ;;  %s90_s3 = int_to_ptr.vmem [resolvable:$true] %s89_s3 }
   0xe   :  { %s2030_s29 = smov 24   ;;  %s2031_s30 = smov [#allocation15]  }
   0xf   :  { %95 = dma.hbm_to_vmem [thread:$0]  %s88_s23, 6144, %s90_s3, [#allocation13], %s2029_s28, %s2029_s28, %s2030_s29  }
  0x10   :  { %s119_s14 = sshll.u32 %s2031_s30, 4  ;;  %s29_s5 = sshll.u32 %s2831_s0, 4  ;;  %s120_s14 = int_to_ptr.vmem [resolvable:$true] %s119_s14  ;;  %s30_s5 = int_to_ptr.hbm [resolvable:$true] %s29_s5 }
  0x11   :  { %125 = dma.hbm_to_vmem [thread:$0]  %s118_s27, 2048, %s120_s14, [#allocation16], %s2026_s20, %s2026_s20, %s2027_s21  }
  0x12   :  { %s53_s18 = sshll.u32 %s2833_s2, 4  ;;  %s2032_s19 = smov [#allocation3]   ;;  %s54_s18 = int_to_ptr.hbm [resolvable:$true] %s53_s18 }
  0x13   :  { %s31_s1 = sshll.u32 %s2032_s19, 4  ;;  %s2033_s22 = smov [#allocation8]   ;;  %s32_s1 = int_to_ptr.vmem [resolvable:$true] %s31_s1 }
  0x14   :  { %34 = dma.hbm_to_vmem [thread:$0]  %s30_s5, 128, %s32_s1, [#allocation4]  }
  0x15   :  { %s55_s23 = sshll.u32 %s2033_s22, 4  ;;  %s77_s0 = sshll.u32 %s2835_s4, 4  ;;  %s56_s23 = int_to_ptr.vmem [resolvable:$true] %s55_s23  ;;  %s78_s0 = int_to_ptr.hbm [resolvable:$true] %s77_s0 }
  0x16   :  { %58 = dma.hbm_to_vmem [thread:$0]  %s54_s18, 32, %s56_s23, [#allocation7]  }
  0x17   :  { %s102_s27 = sshll.u32 %s2838_s7, 4  ;;  %s2034_s30 = smov [#allocation11]   ;;  %s103_s27 = int_to_ptr.hbm [resolvable:$true] %s102_s27 }
  0x18   :  { %s79_s2 = sshll.u32 %s2034_s30, 4  ;;  %s2035_s14 = smov [#allocation14]   ;;  %s80_s2 = int_to_ptr.vmem [resolvable:$true] %s79_s2 }
  0x19   :  { %82 = dma.hbm_to_vmem [thread:$0]  %s78_s0, 16, %s80_s2, [#allocation10]  }
  0x1a   :  { %s104_s15 = sshll.u32 %s2035_s14, 4  ;;  %s132_s9 = sshll.u32 %s2842_s11, 4  ;;  %s105_s15 = int_to_ptr.vmem [resolvable:$true] %s104_s15  ;;  %s133_s9 = int_to_ptr.hbm [resolvable:$true] %s132_s9 }
  0x1b   :  { %110 = dma.hbm_to_vmem [thread:$0]  %s103_s27, 6144, %s105_s15, [#allocation13], %s2029_s28, %s2029_s28, %s2030_s29  }
  0x1c   :  { %s2036_s4 = smov [#allocation17]  }
  0x1d   :  { %s134_s17 = sshll.u32 %s2036_s4, 4  ;;  %s135_s17 = int_to_ptr.vmem [resolvable:$true] %s134_s17 }
  0x1e   :  { %140 = dma.hbm_to_vmem [thread:$0]  %s133_s9, 2048, %s135_s17, [#allocation16], %s2026_s20, %s2026_s20, %s2027_s21  }
  0x1f   :  { %2010 = dma.done.wait [#allocation4], 128  }
  0x20   :  { %2011 = vsyncadd [#allocation4], 4294967168 }
  0x21   :  { %2012 = dma.done.wait [#allocation7], 1056  }
  0x22   :  { %2013 = vsyncadd [#allocation7], 4294966240 }
  0x23   :  { %2014 = dma.done.wait [#allocation10], 4112  }
  0x24   :  { %2015 = vsyncadd [#allocation10], 4294963184 }
  0x25   :  { %2016 = dma.done.wait [#allocation13], 12288  }
  0x26   :  { %2017 = vsyncadd [#allocation13], 4294955008 }
  0x27   :  { %2018 = dma.done.wait [#allocation16], 4096  }
  0x28   :  { %2019 = vsyncadd [#allocation16], 4294963200  ;;  %v186_v0 = vld [vmem:[#allocation6 + $0x30] sm:$0xff]  ;;  %v184_v1 = vld [vmem:[#allocation6 + $0x20] sm:$0xff]  ;;  %vm194_vm0 = vcmask 261120   ;;  %s1584_s1 = sshll.u32 %s2844_s13, 4  ;;  %s1585_s1 = int_to_ptr.hbm [resolvable:$true] %s1584_s1 }
  0x29   :  { %210 = vmatpush.msra.mxu1 %v186_v0  ;;  %v182_v2 = vld [vmem:[#allocation6 + $0x10] sm:$0xff]  ;;  %v255_v3 = vld [vmem:[#allocation9 + $0x78] sm:$0xff]  ;;  %v252_v12 = vld [vmem:[#allocation9 + $0x60] sm:$0xff] }
  0x2a   :  { %v254_v4 = vld [vmem:[#allocation9 + $0x70] sm:$0xff]  ;;  %v180_v5 = vld [vmem:[#allocation6] sm:$0xff]  ;;  %276 = vmatpush.msra.mxu2 %v255_v3  ;;  %v253_v8 = vld [vmem:[#allocation9 + $0x68] sm:$0xff] }
  0x2b   :  { %211 = vmatpush.msra.mxu1 %v184_v1  ;;  %v271_v6 = vld [vmem:[#allocation9 + $0xf8] sm:$0xff]  ;;  %v270_v9 = vld [vmem:[#allocation9 + $0xf0] sm:$0xff]  ;;  %v269_v11 = vld [vmem:[#allocation9 + $0xe8] sm:$0xff] }
  0x2c   :  { %v179_v7 = vld [vmem:[#allocation3] sm:$0xff]  ;;  %296 = vmatpush.msra.mxu3 %v271_v6  ;;  %277 = vmatpush.msra.mxu2 %v254_v4  ;;  %v185_v13 = vld [vmem:[#allocation6 + $0x28] sm:$0xff]  ;;  %v188_v1 = vld [vmem:[#allocation8] sm:$0x3] }
  0x2d   :  { %212 = vmatpush.msra.mxu1 %v182_v2  ;;  %v187_v10 = vld [vmem:[#allocation6 + $0x38] sm:$0xff]  ;;  %v268_v14 = vld [vmem:[#allocation9 + $0xe0] sm:$0xff]  ;;  %v249_v21 = vld [vmem:[#allocation9 + $0x48] sm:$0xff] }
  0x2e   :  { %297 = vmatpush.msra.mxu3 %v270_v9  ;;  %278 = vmatpush.msra.mxu2 %v253_v8  ;;  %v251_v15 = vld [vmem:[#allocation9 + $0x58] sm:$0xff]  ;;  %v250_v18 = vld [vmem:[#allocation9 + $0x50] sm:$0xff]  ;;  %v181_v19 = vld [vmem:[#allocation6 + $0x8] sm:$0xff]  ;;  %v190_v8 = vperm.slane %v188_v1, 0 }
  0x2f   :  { %213 = vmatpush.msra.mxu1 %v180_v5  ;;  %v183_v16 = vld [vmem:[#allocation6 + $0x18] sm:$0xff]  ;;  %v265_v22 = vld [vmem:[#allocation9 + $0xc8] sm:$0xff]  ;;  %v248_v23 = vld [vmem:[#allocation9 + $0x40] sm:$0xff] }
  0x30   :  { %1598 = vmatmul.msk.f32.vlgmr.msra.gmra.mxu1 %vm194_vm0, %v179_v7  ;;  %298 = vmatpush.msra.mxu3 %v269_v11  ;;  %v267_v17 = vld [vmem:[#allocation9 + $0xd8] sm:$0xff]  ;;  %v266_v20 = vld [vmem:[#allocation9 + $0xd0] sm:$0xff]  ;;  %v264_v24 = vld [vmem:[#allocation9 + $0xc0] sm:$0xff] }
  0x31   :  { %230 = vmatpush.msrb.mxu1 %v187_v10  ;;  %279 = vmatpush.msra.mxu2 %v252_v12  ;;  %v247_v25 = vld [vmem:[#allocation9 + $0x38] sm:$0xff]  ;;  %v246_v27 = vld [vmem:[#allocation9 + $0x30] sm:$0xff]  ;;  %v245_v28 = vld [vmem:[#allocation9 + $0x28] sm:$0xff] }
  0x32   :  { %299 = vmatpush.msra.mxu3 %v268_v14  ;;  %v263_v26 = vld [vmem:[#allocation9 + $0xb8] sm:$0xff]  ;;  %v244_v29 = vld [vmem:[#allocation9 + $0x20] sm:$0xff]  ;;  %v242_v31 = vld [vmem:[#allocation9 + $0x10] sm:$0xff] }
  0x33   :  { %231 = vmatpush.msrb.mxu1 %v185_v13  ;;  %280 = vmatpush.msra.mxu2 %v251_v15  ;;  %v243_v30 = vld [vmem:[#allocation9 + $0x18] sm:$0xff]  ;;  %v262_v32 = vld [vmem:[#allocation9 + $0xb0] sm:$0xff]  ;;  %v241_v33 = vld [vmem:[#allocation9 + $0x8] sm:$0xff] }
  0x34   :  { %300 = vmatpush.msra.mxu3 %v267_v17  ;;  %v261_v34 = vld [vmem:[#allocation9 + $0xa8] sm:$0xff]  ;;  %v240_v35 = vld [vmem:[#allocation9] sm:$0xff]  ;;  %v259_v37 = vld [vmem:[#allocation9 + $0x98] sm:$0xff] }
  0x35   :  { %232 = vmatpush.msrb.mxu1 %v183_v16  ;;  %281 = vmatpush.msra.mxu2 %v250_v18  ;;  %v260_v36 = vld [vmem:[#allocation9 + $0xa0] sm:$0xff]  ;;  %v258_v38 = vld [vmem:[#allocation9 + $0x90] sm:$0xff]  ;;  %v257_v39 = vld [vmem:[#allocation9 + $0x88] sm:$0xff] }
  0x36   :  { %301 = vmatpush.msra.mxu3 %v266_v20  ;;  %v256_v40 = vld [vmem:[#allocation9 + $0x80] sm:$0xff]  ;;  %v362_v41 = vld [vmem:[#allocation12 + $0x168] sm:$0xff]  ;;  %v359_v42 = vld [vmem:[#allocation12 + $0x150] sm:$0xff] }
  0x37   :  { %233 = vmatpush.msrb.mxu1 %v181_v19  ;;  %282 = vmatpush.msra.mxu2 %v249_v21  ;;  %v356_v43 = vld [vmem:[#allocation12 + $0x138] sm:$0xff]  ;;  %v2153_v44 = vld [vmem:[#allocation14 + $0x168] sm:$0xff]  ;;  %v2155_v45 = vld [vmem:[#allocation14 + $0x150] sm:$0xff] }
  0x38   :  { %1599 = vmatmul.msk.f32.vlgmr.msrb.gmra.mxu1 %vm194_vm0, %v179_v7  ;;  %302 = vmatpush.msra.mxu3 %v265_v22  ;;  %v353_v46 = vld [vmem:[#allocation12 + $0x120] sm:$0xff]  ;;  %v2158_v47 = vld [vmem:[#allocation14 + $0x138] sm:$0xff]  ;;  %v363_v48 = vld [vmem:[#allocation12 + $0x170] sm:$0xff] }
  0x39   :  { %283 = vmatpush.msra.mxu2 %v248_v23  ;;  %373 = vmatpush.msra.mxu0 %v362_v41  ;;  %v364_v49 = vld [vmem:[#allocation12 + $0x178] sm:$0xff]  ;;  %v350_v50 = vld [vmem:[#allocation12 + $0x108] sm:$0xff]  ;;  %v361_v52 = vld [vmem:[#allocation12 + $0x160] sm:$0xff] }
  0x3a   :  { %303 = vmatpush.msra.mxu3 %v264_v24  ;;  %393 = vmatpush.msra.mxu1 %v363_v48  ;;  %v360_v51 = vld [vmem:[#allocation12 + $0x158] sm:$0xff]  ;;  %v2161_v53 = vld [vmem:[#allocation14 + $0x120] sm:$0xff]  ;;  %v347_v55 = vld [vmem:[#allocation12 + $0xf0] sm:$0xff] }
  0x3b   :  { %284 = vmatpush.msra.mxu2 %v247_v25  ;;  %374 = vmatpush.msra.mxu0 %v359_v42  ;;  %v357_v54 = vld [vmem:[#allocation12 + $0x140] sm:$0xff]  ;;  %v358_v56 = vld [vmem:[#allocation12 + $0x148] sm:$0xff]  ;;  %v344_v59 = vld [vmem:[#allocation12 + $0xd8] sm:$0xff] }
  0x3c   :  { %304 = vmatpush.msra.mxu3 %v263_v26  ;;  %394 = vmatpush.msra.mxu1 %v360_v51  ;;  %v2164_v57 = vld [vmem:[#allocation14 + $0x108] sm:$0xff]  ;;  %v355_v60 = vld [vmem:[#allocation12 + $0x130] sm:$0xff]  ;;  %v341_v63 = vld [vmem:[#allocation12 + $0xc0] sm:$0xff]  ;;  %v191_v26 = vperm.slane %v188_v1, 1 }
  0x3d   :  { %285 = vmatpush.msra.mxu2 %v246_v27  ;;  %375 = vmatpush.msra.mxu0 %v356_v43  ;;  %v354_v58 = vld [vmem:[#allocation12 + $0x128] sm:$0xff]  ;;  %v2167_v61 = vld [vmem:[#allocation14 + $0xf0] sm:$0xff]  ;;  %v352_v0 = vld [vmem:[#allocation12 + $0x118] sm:$0xff] }
  0x3e   :  { %305 = vmatpush.msra.mxu3 %v262_v32  ;;  %395 = vmatpush.msra.mxu1 %v357_v54  ;;  %v351_v62 = vld [vmem:[#allocation12 + $0x110] sm:$0xff]  ;;  %v2170_v2 = vld [vmem:[#allocation14 + $0xd8] sm:$0xff]  ;;  %v338_v4 = vld [vmem:[#allocation12 + $0xa8] sm:$0xff] }
  0x3f   :  { %286 = vmatpush.msra.mxu2 %v245_v28  ;;  %376 = vmatpush.msra.mxu0 %v353_v46  ;;  %v348_v3 = vld [vmem:[#allocation12 + $0xf8] sm:$0xff]  ;;  %v349_v5 = vld [vmem:[#allocation12 + $0x100] sm:$0xff]  ;;  %v335_v9 = vld [vmem:[#allocation12 + $0x90] sm:$0xff] }
  0x40   :  { %306 = vmatpush.msra.mxu3 %v261_v34  ;;  %396 = vmatpush.msra.mxu1 %v354_v58  ;;  %v2173_v6 = vld [vmem:[#allocation14 + $0xc0] sm:$0xff]  ;;  %v346_v10 = vld [vmem:[#allocation12 + $0xe8] sm:$0xff]  ;;  %v332_v13 = vld [vmem:[#allocation12 + $0x78] sm:$0xff] }
  0x41   :  { %287 = vmatpush.msra.mxu2 %v244_v29  ;;  %377 = vmatpush.msra.mxu0 %v350_v50  ;;  %v345_v7 = vld [vmem:[#allocation12 + $0xe0] sm:$0xff]  ;;  %v2176_v11 = vld [vmem:[#allocation14 + $0xa8] sm:$0xff]  ;;  %v343_v14 = vld [vmem:[#allocation12 + $0xd0] sm:$0xff] }
  0x42   :  { %307 = vmatpush.msra.mxu3 %v260_v36  ;;  %397 = vmatpush.msra.mxu1 %v351_v62  ;;  %v342_v12 = vld [vmem:[#allocation12 + $0xc8] sm:$0xff]  ;;  %v2179_v16 = vld [vmem:[#allocation14 + $0x90] sm:$0xff]  ;;  %v329_v19 = vld [vmem:[#allocation12 + $0x60] sm:$0xff]  ;;  %v2037_v62 = vmov 0.0  }
  0x43   :  { %288 = vmatpush.msra.mxu2 %v243_v30  ;;  %378 = vmatpush.msra.mxu0 %v347_v55  ;;  %v339_v17 = vld [vmem:[#allocation12 + $0xb0] sm:$0xff]  ;;  %v340_v20 = vld [vmem:[#allocation12 + $0xb8] sm:$0xff]  ;;  %v326_v23 = vld [vmem:[#allocation12 + $0x48] sm:$0xff] }
  0x44   :  { %308 = vmatpush.msra.mxu3 %v259_v37  ;;  %398 = vmatpush.msra.mxu1 %v348_v3  ;;  %v2182_v21 = vld [vmem:[#allocation14 + $0x78] sm:$0xff]  ;;  %v2185_v25 = vld [vmem:[#allocation14 + $0x60] sm:$0xff]  ;;  %v323_v27 = vld [vmem:[#allocation12 + $0x30] sm:$0xff] }
  0x45   :  { %289 = vmatpush.msra.mxu2 %v242_v31  ;;  %379 = vmatpush.msra.mxu0 %v344_v59  ;;  %v336_v24 = vld [vmem:[#allocation12 + $0x98] sm:$0xff]  ;;  %v317_v31 = vld [vmem:[#allocation12] sm:$0xff]  ;;  %v2189_v32 = vld [vmem:[#allocation14 + $0x170] sm:$0xff] }
  0x46   :  { %309 = vmatpush.msra.mxu3 %v258_v38  ;;  %399 = vmatpush.msra.mxu1 %v345_v7  ;;  %v320_v28 = vld [vmem:[#allocation12 + $0x18] sm:$0xff]  ;;  %v2197_v36 = vld [vmem:[#allocation14 + $0x128] sm:$0xff]  ;;  %v2200_v37 = vld [vmem:[#allocation14 + $0x110] sm:$0xff] }
  0x47   :  { %290 = vmatpush.msra.mxu2 %v241_v33  ;;  %380 = vmatpush.msra.mxu0 %v341_v63  ;;  %v2191_v34 = vld [vmem:[#allocation14 + $0x158] sm:$0xff]  ;;  %v337_v38 = vld [vmem:[#allocation12 + $0xa0] sm:$0xff]  ;;  %v334_v42 = vld [vmem:[#allocation12 + $0x88] sm:$0xff] }
  0x48   :  { %310 = vmatpush.msra.mxu3 %v257_v39  ;;  %400 = vmatpush.msra.mxu1 %v342_v12  ;;  %v2204_v39 = vld [vmem:[#allocation14 + $0x48] sm:$0xff]  ;;  %v333_v41 = vld [vmem:[#allocation12 + $0x80] sm:$0xff]  ;;  %v2210_v43 = vld [vmem:[#allocation14 + $0x30] sm:$0xff] }
  0x49   :  { %291 = vmatpush.msra.mxu2 %v240_v35  ;;  %381 = vmatpush.msra.mxu0 %v338_v4  ;;  %v2194_v35 = vld [vmem:[#allocation14 + $0x140] sm:$0xff]  ;;  %v330_v48 = vld [vmem:[#allocation12 + $0x68] sm:$0xff]  ;;  %v2215_v50 = vld [vmem:[#allocation14 + $0x18] sm:$0xff] }
  0x4a   :  { %311 = vmatpush.msra.mxu3 %v256_v40  ;;  %401 = vmatpush.msra.mxu1 %v339_v17  ;;  %v2206_v40 = vld [vmem:[#allocation14 + $0xf8] sm:$0xff]  ;;  %v2212_v46 = vld [vmem:[#allocation14 + $0xe0] sm:$0xff]  ;;  %2869 = vst [vmem:[#allocation25_spill] sm:$0xff] %v2215_v50  ;;  %v2218_v51 = vld [vmem:[#allocation14 + $0xc8] sm:$0xff] }
  0x4b   :  { %413 = vmatpush.msrb.mxu2 %v364_v49  ;;  %382 = vmatpush.msra.mxu0 %v335_v9  ;;  %v331_v49 = vld [vmem:[#allocation12 + $0x70] sm:$0xff]  ;;  %v328_v54 = vld [vmem:[#allocation12 + $0x58] sm:$0xff]  ;;  %v2221_v55 = vld [vmem:[#allocation14] sm:$0xff] }
  0x4c   :  { %489 = vmatpush.msrb.mxu3 %v2153_v44  ;;  %402 = vmatpush.msra.mxu1 %v336_v24  ;;  %2870 = vst [vmem:[#allocation26_spill] sm:$0xff] %v2221_v55  ;;  %v324_v58 = vld [vmem:[#allocation12 + $0x38] sm:$0xff]  ;;  %v325_v59 = vld [vmem:[#allocation12 + $0x40] sm:$0xff]  ;;  %v318_v3 = vld [vmem:[#allocation12 + $0x8] sm:$0xff] }
  0x4d   :  { %414 = vmatpush.msrb.mxu2 %v361_v52  ;;  %383 = vmatpush.msra.mxu0 %v332_v13  ;;  %v327_v52 = vld [vmem:[#allocation12 + $0x50] sm:$0xff]  ;;  %v321_v63 = vld [vmem:[#allocation12 + $0x20] sm:$0xff]  ;;  %v2238_v7 = vld [vmem:[#allocation14 + $0x178] sm:$0xff] }
  0x4e   :  { %490 = vmatpush.msrb.mxu3 %v2155_v45  ;;  %403 = vmatpush.msra.mxu1 %v333_v41  ;;  %v2232_v1 = vld [vmem:[#allocation14 + $0x80] sm:$0xff]  ;;  %v319_v4 = vld [vmem:[#allocation12 + $0x10] sm:$0xff]  ;;  %v2252_v12 = vld [vmem:[#allocation14 + $0x148] sm:$0xff] }
  0x4f   :  { %415 = vmatpush.msrb.mxu2 %v358_v56  ;;  %384 = vmatpush.msra.mxu0 %v329_v19  ;;  %v2223_v56 = vld [vmem:[#allocation14 + $0xb0] sm:$0xff]  ;;  %v2245_v9 = vld [vmem:[#allocation14 + $0x160] sm:$0xff]  ;;  %v2264_v17 = vld [vmem:[#allocation14 + $0x118] sm:$0xff] }
  0x50   :  { %491 = vmatpush.msrb.mxu3 %v2158_v47  ;;  %404 = vmatpush.msra.mxu1 %v330_v48  ;;  %v2254_v13 = vld [vmem:[#allocation14 + $0x20] sm:$0xff]  ;;  %v2276_v19 = vld [vmem:[#allocation14 + $0xe8] sm:$0xff]  ;;  %v2321_v41 = vld [vmem:[#allocation14 + $0x10] sm:$0xff] }
  0x51   :  { %416 = vmatpush.msrb.mxu2 %v355_v60  ;;  %385 = vmatpush.msra.mxu0 %v326_v23  ;;  %v2228_v60 = vld [vmem:[#allocation14 + $0x98] sm:$0xff]  ;;  %2872 = vst [vmem:[#allocation28_spill] sm:$0xff] %v2254_v13  ;;  %v2291_v23 = vld [vmem:[#allocation14 + $0xa0] sm:$0xff]  ;;  %v2296_v24 = vld [vmem:[#allocation14 + $0x88] sm:$0xff] }
  0x52   :  { %492 = vmatpush.msrb.mxu3 %v2161_v53  ;;  %405 = vmatpush.msra.mxu1 %v327_v52  ;;  %2875 = vst [vmem:[#allocation31_spill] sm:$0xff] %v2321_v41  ;;  %v365_v52 = vld [vmem:[%s2837_s6] sm:$0x7] }
  0x53   :  { %417 = vmatpush.msrb.mxu2 %v352_v0  ;;  %386 = vmatpush.msra.mxu0 %v323_v27  ;;  %v322_v0 = vld [vmem:[#allocation12 + $0x28] sm:$0xff]  ;;  %v2306_v27 = vld [vmem:[#allocation14 + $0x58] sm:$0xff] }
  0x54   :  { %493 = vmatpush.msrb.mxu3 %v2164_v57  ;;  %406 = vmatpush.msra.mxu1 %v324_v58 }
  0x55   :  { %418 = vmatpush.msrb.mxu2 %v349_v5  ;;  %387 = vmatpush.msra.mxu0 %v320_v28  ;;  %v2236_v5 = vld [vmem:[#allocation14 + $0x68] sm:$0xff]  ;;  %v1633_v28 = vld [vmem:[#allocation11] ss:$0 sm:$0xff] }
  0x56   :  { %494 = vmatpush.msrb.mxu3 %v2167_v61  ;;  %407 = vmatpush.msra.mxu1 %v321_v63 }
  0x57   :  { %419 = vmatpush.msrb.mxu2 %v346_v10  ;;  %388 = vmatpush.msra.mxu0 %v317_v31  ;;  %v2247_v10 = vld [vmem:[#allocation14 + $0x38] sm:$0xff]  ;;  %v2316_v31 = vld [vmem:[#allocation14 + $0x28] sm:$0xff] }
  0x58   :  { %495 = vmatpush.msrb.mxu3 %v2170_v2  ;;  %408 = vmatpush.msra.mxu1 %v318_v3  ;;  %2871 = vst [vmem:[#allocation27_spill] sm:$0xff] %v2247_v10 }
  0x59   :  { %420 = vmatpush.msrb.mxu2 %v343_v14  ;;  %509 = vmatpush.msrb.mxu0 %v2189_v32  ;;  %v2256_v14 = vld [vmem:[#allocation14 + $0x130] sm:$0xff]  ;;  %2874 = vst [vmem:[#allocation30_spill] sm:$0xff] %v2316_v31 }
  0x5a   :  { %496 = vmatpush.msrb.mxu3 %v2173_v6  ;;  %529 = vmatpush.msrb.mxu1 %v2238_v7 }
  0x5b   :  { %421 = vmatpush.msrb.mxu2 %v340_v20  ;;  %510 = vmatpush.msrb.mxu0 %v2191_v34  ;;  %v2281_v20 = vld [vmem:[#allocation14 + $0xd0] sm:$0xff] }
  0x5c   :  { %497 = vmatpush.msrb.mxu3 %v2176_v11  ;;  %530 = vmatpush.msrb.mxu1 %v2245_v9 }
  0x5d   :  { %511 = vmatpush.msrb.mxu0 %v2194_v35  ;;  %422 = vmatpush.msrb.mxu2 %v337_v38 }
  0x5e   :  { %498 = vmatpush.msrb.mxu3 %v2179_v16  ;;  %531 = vmatpush.msrb.mxu1 %v2252_v12 }
  0x5f   :  { %512 = vmatpush.msrb.mxu0 %v2197_v36  ;;  %423 = vmatpush.msrb.mxu2 %v334_v42 }
  0x60   :  { %499 = vmatpush.msrb.mxu3 %v2182_v21  ;;  %532 = vmatpush.msrb.mxu1 %v2256_v14 }
  0x61   :  { %513 = vmatpush.msrb.mxu0 %v2200_v37  ;;  %424 = vmatpush.msrb.mxu2 %v331_v49  ;;  %v481_v49 = vld [vmem:[%s2839_s8] sm:$0x7] }
  0x62   :  { %500 = vmatpush.msrb.mxu3 %v2185_v25  ;;  %533 = vmatpush.msrb.mxu1 %v2264_v17 }
  0x63   :  { %514 = vmatpush.msrb.mxu0 %v2206_v40  ;;  %425 = vmatpush.msrb.mxu2 %v328_v54  ;;  %v2434_v54 = vperm.slane %v481_v49, 0 }
  0x64   :  { %501 = vmatpush.msrb.mxu3 %v2204_v39 }
  0x65   :  { %515 = vmatpush.msrb.mxu0 %v2212_v46  ;;  %426 = vmatpush.msrb.mxu2 %v325_v59  ;;  %2876 = vst [vmem:[#allocation32_spill] sm:$0xff] %v2434_v54  ;;  %v367_v59 = vperm.slane %v365_v52, 0 }
  0x66   :  { %502 = vmatpush.msrb.mxu3 %v2210_v43 }
  0x67   :  { %516 = vmatpush.msrb.mxu0 %v2218_v51  ;;  %427 = vmatpush.msrb.mxu2 %v322_v0 }
  0x68   :  { %503 = vmatpush.msrb.mxu3 %v2215_v50 }
  0x69   :  { %517 = vmatpush.msrb.mxu0 %v2223_v56  ;;  %428 = vmatpush.msrb.mxu2 %v319_v4  ;;  %v368_v4 = vperm.slane %v365_v52, 1 }
  0x6a   :  { %504 = vmatpush.msrb.mxu3 %v2221_v55 }
  0x6b   :  { %518 = vmatpush.msrb.mxu0 %v2228_v60 }
  0x6d   :  { %519 = vmatpush.msrb.mxu0 %v2232_v1 }
  0x6f   :  { %520 = vmatpush.msrb.mxu0 %v2236_v5 }
  0xad   :  { %v215_v15 = vpop.f32.mrf.mxu1 }
  0xae   :  { %v216_v18 = vadd.f32 %v215_v15, %v190_v8  ;;  %v2243_v8 = vld [vmem:[#allocation14 + $0x50] sm:$0xff]  ;;  %v2262_v15 = vld [vmem:[#allocation14 + $0x8] sm:$0xff] }
  0xaf   :  { %521 = vmatpush.msrb.mxu0 %v2243_v8  ;;  %2873 = vst [vmem:[#allocation29_spill] sm:$0xff] %v2262_v15 }
  0xb0   :  { %v238_v22 = vmax.f32 %v216_v18, 0.0  ;;  %v2274_v18 = vld [vmem:[#allocation14 + $0x100] sm:$0xff] }
  0xb1   :  { %522 = vmatpush.msrb.mxu0 %v2247_v10  ;;  %534 = vmatpush.msrb.mxu1 %v2274_v18 }
  0xb2   :  { %292 = vmatmul.f32.vlgmr.msra.gmra.mxu2 %v238_v22  ;;  %v2286_v22 = vld [vmem:[#allocation14 + $0xb8] sm:$0xff] }
  0xb3   :  { %596 = vmatpush.msra.mxu2 %v2153_v44  ;;  %523 = vmatpush.msrb.mxu0 %v2254_v13 }
  0xb4   :  { %535 = vmatpush.msrb.mxu1 %v2276_v19 }
  0xb5   :  { %v235_v29 = vpop.f32.mrf.mxu1  ;;  %597 = vmatpush.msra.mxu2 %v2155_v45  ;;  %524 = vmatpush.msrb.mxu0 %v2262_v15 }
  0xb6   :  { %v236_v30 = vadd.f32 %v235_v29, %v191_v26  ;;  %536 = vmatpush.msrb.mxu1 %v2281_v20  ;;  %v2301_v26 = vld [vmem:[#allocation14 + $0x70] sm:$0xff] }
  0xb7   :  { %598 = vmatpush.msra.mxu2 %v2158_v47 }
  0xb8   :  { %v239_v33 = vmax.f32 %v236_v30, 0.0  ;;  %537 = vmatpush.msrb.mxu1 %v2286_v22  ;;  %v2311_v30 = vld [vmem:[#allocation14 + $0x40] sm:$0xff] }
  0xb9   :  { %599 = vmatpush.msra.mxu2 %v2161_v53 }
  0xba   :  { %312 = vmatmul.f32.vlgmr.msra.gmra.mxu3 %v239_v33  ;;  %538 = vmatpush.msrb.mxu1 %v2291_v23 }
  0xbb   :  { %616 = vmatpush.msra.mxu3 %v2189_v32  ;;  %600 = vmatpush.msra.mxu2 %v2164_v57 }
  0xbc   :  { %539 = vmatpush.msrb.mxu1 %v2296_v24 }
  0xbd   :  { %617 = vmatpush.msra.mxu3 %v2191_v34  ;;  %601 = vmatpush.msra.mxu2 %v2167_v61 }
  0xbe   :  { %540 = vmatpush.msrb.mxu1 %v2301_v26 }
  0xbf   :  { %618 = vmatpush.msra.mxu3 %v2194_v35  ;;  %602 = vmatpush.msra.mxu2 %v2170_v2 }
  0xc0   :  { %541 = vmatpush.msrb.mxu1 %v2306_v27 }
  0xc1   :  { %619 = vmatpush.msra.mxu3 %v2197_v36  ;;  %603 = vmatpush.msra.mxu2 %v2173_v6 }
  0xc2   :  { %505 = vmatmul.f32.vlgmr.msrb.gmra.mxu3 %v2037_v62  ;;  %542 = vmatpush.msrb.mxu1 %v2311_v30 }
  0xc3   :  { %620 = vmatpush.msra.mxu3 %v2200_v37  ;;  %604 = vmatpush.msra.mxu2 %v2176_v11 }
  0xc4   :  { %543 = vmatpush.msrb.mxu1 %v2316_v31 }
  0xc5   :  { %621 = vmatpush.msra.mxu3 %v2206_v40  ;;  %605 = vmatpush.msra.mxu2 %v2179_v16 }
  0xc6   :  { %544 = vmatpush.msrb.mxu1 %v2321_v41 }
  0xc7   :  { %622 = vmatpush.msra.mxu3 %v2212_v46  ;;  %606 = vmatpush.msra.mxu2 %v2182_v21 }
  0xc9   :  { %623 = vmatpush.msra.mxu3 %v2218_v51  ;;  %607 = vmatpush.msra.mxu2 %v2185_v25 }
  0xcb   :  { %624 = vmatpush.msra.mxu3 %v2223_v56  ;;  %608 = vmatpush.msra.mxu2 %v2204_v39 }
  0xcd   :  { %625 = vmatpush.msra.mxu3 %v2228_v60  ;;  %609 = vmatpush.msra.mxu2 %v2210_v43 }
  0xcf   :  { %626 = vmatpush.msra.mxu3 %v2232_v1  ;;  %610 = vmatpush.msra.mxu2 %v2215_v50 }
  0xd1   :  { %627 = vmatpush.msra.mxu3 %v2236_v5  ;;  %611 = vmatpush.msra.mxu2 %v2221_v55 }
  0xd3   :  { %628 = vmatpush.msra.mxu3 %v2243_v8 }
  0xd5   :  { %629 = vmatpush.msra.mxu3 %v2247_v10 }
  0xd7   :  { %630 = vmatpush.msra.mxu3 %v2254_v13 }
  0xd9   :  { %631 = vmatpush.msra.mxu3 %v2262_v15 }
  0xdb   :  { %761 = vmatpush.msrb.mxu3 %v2238_v7 }
  0xdd   :  { %762 = vmatpush.msrb.mxu3 %v2245_v9 }
  0xdf   :  { %763 = vmatpush.msrb.mxu3 %v2252_v12 }
  0xe1   :  { %764 = vmatpush.msrb.mxu3 %v2256_v14 }
  0xe3   :  { %765 = vmatpush.msrb.mxu3 %v2264_v17 }
  0xe5   :  { %766 = vmatpush.msrb.mxu3 %v2274_v18 }
  0xe7   :  { %767 = vmatpush.msrb.mxu3 %v2276_v19 }
  0xe9   :  { %768 = vmatpush.msrb.mxu3 %v2281_v20 }
  0xeb   :  { %769 = vmatpush.msrb.mxu3 %v2286_v22 }
  0xed   :  { %770 = vmatpush.msrb.mxu3 %v2291_v23 }
  0xef   :  { %771 = vmatpush.msrb.mxu3 %v2296_v24 }
  0xf1   :  { %772 = vmatpush.msrb.mxu3 %v2301_v26 }
  0xf3   :  { %773 = vmatpush.msrb.mxu3 %v2306_v27 }
  0xf5   :  { %774 = vmatpush.msrb.mxu3 %v2311_v30 }
  0xf7   :  { %775 = vmatpush.msrb.mxu3 %v2316_v31 }
  0xf9   :  { %776 = vmatpush.msrb.mxu3 %v2321_v41 }
 0x135   :  { %v293_v29 = vpop.f32.mrf.mxu2 }
 0x136   :  { %v294_v33 = vadd.f32 %v1633_v28, %v293_v29  ;;  %v2440_v29 = vperm.slane %v481_v49, 1 }
 0x138   :  { %2878 = vst [vmem:[#allocation34_spill] sm:$0xff] %v2440_v29 }
 0x13d   :  { %v313_v38 = vpop.f32.mrf.mxu3 }
 0x13e   :  { %v314_v42 = vadd.f32 %v313_v38, %v294_v33 }
 0x140   :  { %v316_v48 = vmax.f32 %v314_v42, 0.0 }
 0x142   :  { %389 = vmatmul.f32.vlgmr.msra.gmra.mxu0 %v316_v48  ;;  %409 = vmatmul.f32.vlgmr.msra.gmra.mxu1 %v316_v48 }
 0x143   :  { %429 = vmatmul.f32.vlgmr.msrb.gmra.mxu2 %v316_v48  ;;  %636 = vmatpush.msra.mxu0 %v2238_v7 }
 0x144   :  { %721 = vmatpush.msra.mxu1 %v2153_v44  ;;  %741 = vmatpush.msrb.mxu2 %v2189_v32 }
 0x145   :  { %637 = vmatpush.msra.mxu0 %v2245_v9  ;;  %v506_v58 = vpop.f32.mrf.mxu3 }
 0x146   :  { %722 = vmatpush.msra.mxu1 %v2155_v45  ;;  %742 = vmatpush.msrb.mxu2 %v2191_v34 }
 0x147   :  { %638 = vmatpush.msra.mxu0 %v2252_v12 }
 0x148   :  { %723 = vmatpush.msra.mxu1 %v2158_v47  ;;  %743 = vmatpush.msrb.mxu2 %v2194_v35 }
 0x149   :  { %639 = vmatpush.msra.mxu0 %v2256_v14 }
 0x14a   :  { %525 = vmatmul.f32.vlgmr.msrb.gmra.mxu0 %v2037_v62  ;;  %545 = vmatmul.f32.vlgmr.msrb.gmra.mxu1 %v2037_v62  ;;  %v507_v62 = vadd.f32 %v506_v58, %v2434_v54 }
 0x14b   :  { %640 = vmatpush.msra.mxu0 %v2264_v17  ;;  %724 = vmatpush.msra.mxu1 %v2161_v53 }
 0x14c   :  { %744 = vmatpush.msrb.mxu2 %v2197_v36 }
 0x14d   :  { %641 = vmatpush.msra.mxu0 %v2274_v18  ;;  %725 = vmatpush.msra.mxu1 %v2164_v57 }
 0x14e   :  { %745 = vmatpush.msrb.mxu2 %v2200_v37 }
 0x14f   :  { %642 = vmatpush.msra.mxu0 %v2276_v19  ;;  %726 = vmatpush.msra.mxu1 %v2167_v61 }
 0x150   :  { %746 = vmatpush.msrb.mxu2 %v2206_v40 }
 0x151   :  { %643 = vmatpush.msra.mxu0 %v2281_v20  ;;  %727 = vmatpush.msra.mxu1 %v2170_v2 }
 0x152   :  { %747 = vmatpush.msrb.mxu2 %v2212_v46 }
 0x153   :  { %644 = vmatpush.msra.mxu0 %v2286_v22  ;;  %728 = vmatpush.msra.mxu1 %v2173_v6 }
 0x154   :  { %748 = vmatpush.msrb.mxu2 %v2218_v51 }
 0x155   :  { %645 = vmatpush.msra.mxu0 %v2291_v23  ;;  %729 = vmatpush.msra.mxu1 %v2176_v11 }
 0x156   :  { %749 = vmatpush.msrb.mxu2 %v2223_v56 }
 0x157   :  { %646 = vmatpush.msra.mxu0 %v2296_v24  ;;  %730 = vmatpush.msra.mxu1 %v2179_v16 }
 0x158   :  { %750 = vmatpush.msrb.mxu2 %v2228_v60 }
 0x159   :  { %647 = vmatpush.msra.mxu0 %v2301_v26  ;;  %731 = vmatpush.msra.mxu1 %v2182_v21 }
 0x15a   :  { %751 = vmatpush.msrb.mxu2 %v2232_v1 }
 0x15b   :  { %648 = vmatpush.msra.mxu0 %v2306_v27  ;;  %732 = vmatpush.msra.mxu1 %v2185_v25 }
 0x15c   :  { %752 = vmatpush.msrb.mxu2 %v2236_v5 }
 0x15d   :  { %649 = vmatpush.msra.mxu0 %v2311_v30  ;;  %733 = vmatpush.msra.mxu1 %v2204_v39 }
 0x15e   :  { %753 = vmatpush.msrb.mxu2 %v2243_v8 }
 0x15f   :  { %650 = vmatpush.msra.mxu0 %v2316_v31  ;;  %734 = vmatpush.msra.mxu1 %v2210_v43 }
 0x160   :  { %754 = vmatpush.msrb.mxu2 %v2247_v10 }
 0x161   :  { %651 = vmatpush.msra.mxu0 %v2321_v41  ;;  %735 = vmatpush.msra.mxu1 %v2215_v50 }
 0x162   :  { %755 = vmatpush.msrb.mxu2 %v2254_v13 }
 0x163   :  { %736 = vmatpush.msra.mxu1 %v2221_v55  ;;  %846 = vmatpush.msrb.mxu0 %v2153_v44 }
 0x164   :  { %756 = vmatpush.msrb.mxu2 %v2262_v15 }
 0x165   :  { %866 = vmatpush.msrb.mxu1 %v2189_v32  ;;  %847 = vmatpush.msrb.mxu0 %v2155_v45 }
 0x167   :  { %867 = vmatpush.msrb.mxu1 %v2191_v34  ;;  %848 = vmatpush.msrb.mxu0 %v2158_v47 }
 0x169   :  { %868 = vmatpush.msrb.mxu1 %v2194_v35  ;;  %849 = vmatpush.msrb.mxu0 %v2161_v53 }
 0x16b   :  { %869 = vmatpush.msrb.mxu1 %v2197_v36  ;;  %850 = vmatpush.msrb.mxu0 %v2164_v57 }
 0x16d   :  { %870 = vmatpush.msrb.mxu1 %v2200_v37  ;;  %851 = vmatpush.msrb.mxu0 %v2167_v61 }
 0x16f   :  { %871 = vmatpush.msrb.mxu1 %v2206_v40  ;;  %852 = vmatpush.msrb.mxu0 %v2170_v2 }
 0x171   :  { %872 = vmatpush.msrb.mxu1 %v2212_v46  ;;  %853 = vmatpush.msrb.mxu0 %v2173_v6 }
 0x173   :  { %873 = vmatpush.msrb.mxu1 %v2218_v51  ;;  %854 = vmatpush.msrb.mxu0 %v2176_v11 }
 0x175   :  { %874 = vmatpush.msrb.mxu1 %v2223_v56  ;;  %855 = vmatpush.msrb.mxu0 %v2179_v16 }
 0x177   :  { %875 = vmatpush.msrb.mxu1 %v2228_v60  ;;  %856 = vmatpush.msrb.mxu0 %v2182_v21 }
 0x179   :  { %876 = vmatpush.msrb.mxu1 %v2232_v1  ;;  %857 = vmatpush.msrb.mxu0 %v2185_v25 }
 0x17b   :  { %877 = vmatpush.msrb.mxu1 %v2236_v5  ;;  %858 = vmatpush.msrb.mxu0 %v2204_v39 }
 0x17d   :  { %878 = vmatpush.msrb.mxu1 %v2243_v8  ;;  %859 = vmatpush.msrb.mxu0 %v2210_v43 }
 0x17f   :  { %879 = vmatpush.msrb.mxu1 %v2247_v10  ;;  %860 = vmatpush.msrb.mxu0 %v2215_v50 }
 0x181   :  { %880 = vmatpush.msrb.mxu1 %v2254_v13  ;;  %861 = vmatpush.msrb.mxu0 %v2221_v55 }
 0x183   :  { %881 = vmatpush.msrb.mxu1 %v2262_v15 }
 0x1bf   :  { %v390_v63 = vpop.f32.mrf.mxu0  ;;  %v410_v33 = vpop.f32.mrf.mxu1 }
 0x1c0   :  { %v2437_v0 = vadd.f32 %v390_v63, %v367_v59  ;;  %v2442_v42 = vadd.f32 %v410_v33, %v368_v4 }
 0x1c2   :  { %2877 = vst [vmem:[#allocation33_spill] sm:$0xff] %v2437_v0  ;;  %v549_v3 = vadd.f32 %v507_v62, %v2437_v0  ;;  %v2446_v0 = vperm.slane %v481_v49, 2 }
 0x1c3   :  { %2879 = vst [vmem:[#allocation35_spill] sm:$0xff] %v2442_v42 }
 0x1c4   :  { %v1600_v28 = vmul.f32 -1.442695, %v549_v3  ;;  %2880 = vst [vmem:[#allocation36_spill] sm:$0xff] %v2446_v0 }
 0x1c6   :  { %1636 = vpow2.f32 %v1600_v28 }
 0x1c7   :  { %v526_v38 = vpop.f32.mrf.mxu0  ;;  %v546_v41 = vpop.f32.mrf.mxu1 }
 0x1c8   :  { %v527_v48 = vadd.f32 %v526_v38, %v2440_v29  ;;  %v369_v29 = vperm.slane %v365_v52, 2 }
 0x1ca   :  { %v569_v15 = vadd.f32 %v527_v48, %v2442_v42  ;;  %v547_v48 = vadd.f32 %v546_v41, %v2446_v0 }
 0x1cc   :  { %v1637_v55 = vpop.eup %1636  ;;  %v1601_v58 = vmul.f32 -1.442695, %v569_v15 }
 0x1cd   :  { %v553_v54 = vadd.f32 1.0, %v1637_v55 }
 0x1ce   :  { %1638 = vpow2.f32 %v1601_v58  ;;  %v430_v58 = vpop.f32.mrf.mxu2 }
 0x1cf   :  { %1640 = vrcp.f32 %v553_v54  ;;  %v565_v4 = vand.u32 2147483648, %v553_v54  ;;  %v563_v38 = vand.u32 2147483647, %v553_v54  ;;  %vm559_vm2 = vweird.f32 %v553_v54 }
 0x1d0   :  { %v2449_v50 = vadd.f32 %v430_v58, %v369_v29 }
 0x1d1   :  { %v566_v42 = vor.u32 1.1754944e-38, %v565_v4  ;;  %vm564_vm4 = vcmp.eq.f32.partialorder %v563_v38, 8.507059e+37 }
 0x1d4   :  { %v1639_v59 = vpop.eup %1638 }
 0x1d5   :  { %v1641_v62 = vpop.eup %1640  ;;  %v573_v63 = vadd.f32 1.0, %v1639_v59 }
 0x1d6   :  { %v555_v3 = vmul.f32 %v1641_v62, %v553_v54  ;;  %vm560_vm1 = vweird.f32 %v1641_v62 }
 0x1d7   :  { %1642 = vrcp.f32 %v573_v63  ;;  %vm561_vm3 = vmor %vm559_vm2, %vm560_vm1  ;;  %v585_v52 = vand.u32 2147483648, %v573_v63  ;;  %vm579_vm6 = vweird.f32 %v573_v63  ;;  %v583_v54 = vand.u32 2147483647, %v573_v63 }
 0x1d8   :  { %v556_v28 = vsub.f32 1.0, %v555_v3 }
 0x1d9   :  { %v586_v0 = vor.u32 1.1754944e-38, %v585_v52  ;;  %vm584_vm8 = vcmp.eq.f32.partialorder %v583_v54, 8.507059e+37 }
 0x1da   :  { %v557_v33 = vmul.f32 %v1641_v62, %v556_v28 }
 0x1dc   :  { %v558_v15 = vadd.f32 %v1641_v62, %v557_v33 }
 0x1dd   :  { %v1643_v55 = vpop.eup %1642 }
 0x1de   :  { %v575_v59 = vmul.f32 %v1643_v55, %v573_v63  ;;  %v562_v13 = vsel %vm561_vm3, %v1641_v62, %v558_v15  ;;  %vm580_vm5 = vweird.f32 %v1643_v55 }
 0x1df   :  { %v567_v49 = vsel %vm564_vm4, %v566_v42, %v562_v13  ;;  %vm581_vm7 = vmor %vm579_vm6, %vm580_vm5 }
 0x1e0   :  { %v576_v3 = vsub.f32 1.0, %v575_v59  ;;  %v589_v31 = vmul.f32 %v567_v49, %v547_v48  ;;  %v2888_v48 = vld [vmem:[#allocation32_spill] sm:$0xff] }
 0x1e2   :  { %v577_v28 = vmul.f32 %v1643_v55, %v576_v3  ;;  %v590_v10 = vadd.f32 %v589_v31, %v2449_v50  ;;  %v2886_v31 = vld [vmem:[#allocation26_spill] sm:$0xff]  ;;  %v2890_v3 = vld [vmem:[#allocation33_spill] sm:$0xff] }
 0x1e4   :  { %1644 = vtanh.f32 %v590_v10  ;;  %v578_v41 = vadd.f32 %v1643_v55, %v577_v28  ;;  %v2885_v10 = vld [vmem:[#allocation31_spill] sm:$0xff] }
 0x1e6   :  { %v582_v33 = vsel %vm581_vm7, %v1643_v55, %v578_v41  ;;  %v2889_v55 = vld [vmem:[#allocation34_spill] sm:$0xff]  ;;  %v2891_v41 = vld [vmem:[#allocation35_spill] sm:$0xff] }
 0x1e7   :  { %v587_v13 = vsel %vm584_vm8, %v586_v0, %v582_v33  ;;  %v2887_v0 = vld [vmem:[#allocation29_spill] sm:$0xff] }
 0x1ea   :  { %v1645_v4 = vpop.eup %1644 }
 0x1eb   :  { %v592_v62 = vsub.f32 0.0, %v1645_v4 }
 0x1ed   :  { %v593_v29 = vmul.f32 %v592_v62, %v587_v13 }
 0x1ef   :  { %v2452_v42 = vadd.f32 %v1645_v4, %v593_v29 }
 0x1f1   :  { %595 = vst [vmem:[#allocation2] sm:$0x1] %v2452_v42  ;;  %612 = vmatmul.f32.vlgmr.msra.gmra.mxu2 %v2452_v42  ;;  %632 = vmatmul.f32.vlgmr.msra.gmra.mxu3 %v2452_v42 }
 0x1f2   :  { %652 = vmatmul.f32.vlgmr.msra.gmra.mxu0 %v2452_v42  ;;  %886 = vmatpush.msra.mxu2 %v2238_v7 }
 0x1f3   :  { %971 = vmatpush.msra.mxu3 %v2153_v44  ;;  %991 = vmatpush.msra.mxu0 %v2189_v32  ;;  %v2881_v44 = vld [vmem:[#allocation27_spill] sm:$0xff] }
 0x1f4   :  { %887 = vmatpush.msra.mxu2 %v2245_v9 }
 0x1f5   :  { %972 = vmatpush.msra.mxu3 %v2155_v45  ;;  %992 = vmatpush.msra.mxu0 %v2191_v34  ;;  %v2882_v45 = vld [vmem:[#allocation30_spill] sm:$0xff] }
 0x1f6   :  { %888 = vmatpush.msra.mxu2 %v2252_v12 }
 0x1f7   :  { %973 = vmatpush.msra.mxu3 %v2158_v47  ;;  %993 = vmatpush.msra.mxu0 %v2194_v35  ;;  %v2883_v47 = vld [vmem:[#allocation25_spill] sm:$0xff] }
 0x1f8   :  { %889 = vmatpush.msra.mxu2 %v2256_v14 }
 0x1f9   :  { %974 = vmatpush.msra.mxu3 %v2161_v53  ;;  %994 = vmatpush.msra.mxu0 %v2197_v36  ;;  %v2884_v53 = vld [vmem:[#allocation28_spill] sm:$0xff] }
 0x1fa   :  { %890 = vmatpush.msra.mxu2 %v2264_v17 }
 0x1fb   :  { %975 = vmatpush.msra.mxu3 %v2164_v57  ;;  %995 = vmatpush.msra.mxu0 %v2200_v37 }
 0x1fc   :  { %891 = vmatpush.msra.mxu2 %v2274_v18 }
 0x1fd   :  { %976 = vmatpush.msra.mxu3 %v2167_v61  ;;  %996 = vmatpush.msra.mxu0 %v2206_v40 }
 0x1fe   :  { %892 = vmatpush.msra.mxu2 %v2276_v19 }
 0x1ff   :  { %977 = vmatpush.msra.mxu3 %v2170_v2  ;;  %997 = vmatpush.msra.mxu0 %v2212_v46 }
 0x200   :  { %893 = vmatpush.msra.mxu2 %v2281_v20 }
 0x201   :  { %978 = vmatpush.msra.mxu3 %v2173_v6  ;;  %998 = vmatpush.msra.mxu0 %v2218_v51 }
 0x202   :  { %894 = vmatpush.msra.mxu2 %v2286_v22 }
 0x203   :  { %979 = vmatpush.msra.mxu3 %v2176_v11  ;;  %999 = vmatpush.msra.mxu0 %v2223_v56 }
 0x204   :  { %895 = vmatpush.msra.mxu2 %v2291_v23 }
 0x205   :  { %980 = vmatpush.msra.mxu3 %v2179_v16  ;;  %1000 = vmatpush.msra.mxu0 %v2228_v60 }
 0x206   :  { %896 = vmatpush.msra.mxu2 %v2296_v24 }
 0x207   :  { %981 = vmatpush.msra.mxu3 %v2182_v21  ;;  %1001 = vmatpush.msra.mxu0 %v2232_v1 }
 0x208   :  { %897 = vmatpush.msra.mxu2 %v2301_v26 }
 0x209   :  { %982 = vmatpush.msra.mxu3 %v2185_v25  ;;  %1002 = vmatpush.msra.mxu0 %v2236_v5 }
 0x20a   :  { %898 = vmatpush.msra.mxu2 %v2306_v27 }
 0x20b   :  { %983 = vmatpush.msra.mxu3 %v2204_v39  ;;  %1003 = vmatpush.msra.mxu0 %v2243_v8 }
 0x20c   :  { %899 = vmatpush.msra.mxu2 %v2311_v30 }
 0x20d   :  { %984 = vmatpush.msra.mxu3 %v2210_v43  ;;  %1004 = vmatpush.msra.mxu0 %v2881_v44 }
 0x20e   :  { %900 = vmatpush.msra.mxu2 %v2882_v45 }
 0x20f   :  { %985 = vmatpush.msra.mxu3 %v2883_v47  ;;  %1005 = vmatpush.msra.mxu0 %v2884_v53 }
 0x210   :  { %901 = vmatpush.msra.mxu2 %v2885_v10 }
 0x211   :  { %986 = vmatpush.msra.mxu3 %v2886_v31  ;;  %1006 = vmatpush.msra.mxu0 %v2887_v0 }
 0x274   :  { %v613_v63 = vpop.f32.mrf.mxu2  ;;  %v633_v38 = vpop.f32.mrf.mxu3 }
 0x275   :  { %v614_v15 = vadd.f32 %v613_v63, %v2888_v48  ;;  %v634_v58 = vadd.f32 %v633_v38, %v2889_v55  ;;  %v653_v48 = vpop.f32.mrf.mxu0  ;;  %v2892_v55 = vld [vmem:[#allocation36_spill] sm:$0xff] }
 0x277   :  { %v657_v59 = vrot.slane %v614_v15, 7  ;;  %v680_v49 = vrot.slane %v634_v58, 7 }
 0x279   :  { %v659_v28 = vadd.f32 %v657_v59, %v2890_v3  ;;  %v682_v52 = vadd.f32 %v680_v49, %v2891_v41  ;;  %v654_v59 = vadd.f32 %v653_v48, %v2892_v55 }
 0x27b   :  { %v1602_v54 = vmul.f32 -1.442695, %v659_v28  ;;  %v1603_v33 = vmul.f32 -1.442695, %v682_v52 }
 0x27d   :  { %1646 = vpow2.f32 %v1602_v54 }
 0x27e   :  { %1648 = vpow2.f32 %v1603_v33  ;;  %v703_v33 = vrot.slane %v654_v59, 7 }
 0x283   :  { %v1647_v4 = vpop.eup %1646 }
 0x284   :  { %v1649_v62 = vpop.eup %1648  ;;  %v663_v13 = vadd.f32 1.0, %v1647_v4 }
 0x285   :  { %v686_v29 = vadd.f32 1.0, %v1649_v62 }
 0x286   :  { %1650 = vrcp.f32 %v663_v13  ;;  %v675_v15 = vand.u32 2147483648, %v663_v13  ;;  %v673_v49 = vand.u32 2147483647, %v663_v13  ;;  %vm669_vm10 = vweird.f32 %v663_v13 }
 0x287   :  { %1652 = vrcp.f32 %v686_v29  ;;  %v698_v55 = vand.u32 2147483648, %v686_v29  ;;  %vm692_vm14 = vweird.f32 %v686_v29 }
 0x288   :  { %v676_v52 = vor.u32 1.1754944e-38, %v675_v15  ;;  %vm674_vm12 = vcmp.eq.f32.partialorder %v673_v49, 8.507059e+37 }
 0x28c   :  { %v1651_v0 = vpop.eup %1650 }
 0x28d   :  { %v665_v63 = vmul.f32 %v1651_v0, %v663_v13  ;;  %v1653_v58 = vpop.eup %1652  ;;  %vm670_vm9 = vweird.f32 %v1651_v0 }
 0x28e   :  { %vm671_vm11 = vmor %vm669_vm10, %vm670_vm9  ;;  %v688_v54 = vmul.f32 %v1653_v58, %v686_v29  ;;  %vm693_vm13 = vweird.f32 %v1653_v58 }
 0x28f   :  { %v666_v38 = vsub.f32 1.0, %v665_v63  ;;  %vm694_vm15 = vmor %vm692_vm14, %vm693_vm13 }
 0x290   :  { %v689_v31 = vsub.f32 1.0, %v688_v54 }
 0x291   :  { %v667_v3 = vmul.f32 %v1651_v0, %v666_v38 }
 0x292   :  { %v690_v10 = vmul.f32 %v1653_v58, %v689_v31  ;;  %v2518_v31 = vld [vmem:[#allocation14 + $0x168] sm:$0xff] }
 0x293   :  { %v668_v28 = vadd.f32 %v1651_v0, %v667_v3  ;;  %v696_v3 = vand.u32 2147483647, %v686_v29 }
 0x294   :  { %v691_v48 = vadd.f32 %v1653_v58, %v690_v10 }
 0x295   :  { %v672_v4 = vsel %vm671_vm11, %v1651_v0, %v668_v28  ;;  %v699_v0 = vor.u32 1.1754944e-38, %v698_v55  ;;  %vm697_vm0 = vcmp.eq.f32.partialorder %v696_v3, 8.507059e+37  ;;  %v2528_v55 = vld [vmem:[#allocation14 + $0x138] sm:$0xff] }
 0x296   :  { %v677_v62 = vsel %vm674_vm12, %v676_v52, %v672_v4  ;;  %v695_v15 = vsel %vm694_vm15, %v1653_v58, %v691_v48 }
 0x297   :  { %v705_v41 = vmul.f32 %v703_v33, %v677_v62  ;;  %v700_v28 = vsel %vm697_vm0, %v699_v0, %v695_v15  ;;  %v2900_v62 = vld [vmem:[#allocation36_spill] sm:$0xff] }
 0x299   :  { %v706_v63 = vadd.f32 %v705_v41, %v2449_v50  ;;  %v2533_v41 = vld [vmem:[#allocation14 + $0x120] sm:$0xff] }
 0x29b   :  { %1654 = vtanh.f32 %v706_v63 }
 0x2a1   :  { %v1655_v38 = vpop.eup %1654 }
 0x2a2   :  { %v709_v13 = vrot.slane %v1655_v38, 1 }
 0x2a4   :  { %v711_v59 = vsub.f32 %v2452_v42, %v709_v13  ;;  %v2523_v42 = vld [vmem:[#allocation14 + $0x150] sm:$0xff] }
 0x2a6   :  { %v713_v49 = vrot.slane %v711_v59, 7 }
 0x2a8   :  { %v715_v52 = vmul.f32 %v713_v49, %v700_v28 }
 0x2aa   :  { %v2513_v54 = vadd.f32 %v1655_v38, %v715_v52 }
 0x2ac   :  { %717 = vst [vmem:[#allocation2] sm:$0x2] %v2513_v54  ;;  %v719_v10 = vrot.slane %v2513_v54, 1 }
 0x2ae   :  { %737 = vmatmul.f32.vlgmr.msra.gmra.mxu1 %v719_v10  ;;  %757 = vmatmul.f32.vlgmr.msrb.gmra.mxu2 %v719_v10 }
 0x2af   :  { %777 = vmatmul.f32.vlgmr.msrb.gmra.mxu3 %v719_v10  ;;  %1011 = vmatpush.msra.mxu1 %v2238_v7 }
 0x2b0   :  { %1096 = vmatpush.msrb.mxu2 %v2518_v31  ;;  %1116 = vmatpush.msrb.mxu3 %v2189_v32 }
 0x2b1   :  { %1012 = vmatpush.msra.mxu1 %v2245_v9 }
 0x2b2   :  { %1097 = vmatpush.msrb.mxu2 %v2523_v42  ;;  %1117 = vmatpush.msrb.mxu3 %v2191_v34 }
 0x2b3   :  { %1013 = vmatpush.msra.mxu1 %v2252_v12 }
 0x2b4   :  { %1098 = vmatpush.msrb.mxu2 %v2528_v55  ;;  %1118 = vmatpush.msrb.mxu3 %v2194_v35 }
 0x2b5   :  { %1014 = vmatpush.msra.mxu1 %v2256_v14 }
 0x2b6   :  { %1099 = vmatpush.msrb.mxu2 %v2533_v41  ;;  %1119 = vmatpush.msrb.mxu3 %v2197_v36  ;;  %v2898_v36 = vld [vmem:[#allocation34_spill] sm:$0xff] }
 0x2b7   :  { %1015 = vmatpush.msra.mxu1 %v2264_v17 }
 0x2b8   :  { %1100 = vmatpush.msrb.mxu2 %v2164_v57  ;;  %1120 = vmatpush.msrb.mxu3 %v2200_v37  ;;  %v2893_v57 = vld [vmem:[#allocation31_spill] sm:$0xff] }
 0x2b9   :  { %1016 = vmatpush.msra.mxu1 %v2274_v18 }
 0x2ba   :  { %1101 = vmatpush.msrb.mxu2 %v2167_v61  ;;  %1121 = vmatpush.msrb.mxu3 %v2206_v40  ;;  %v2894_v61 = vld [vmem:[#allocation26_spill] sm:$0xff]  ;;  %v2899_v40 = vld [vmem:[#allocation35_spill] sm:$0xff] }
 0x2bb   :  { %1017 = vmatpush.msra.mxu1 %v2276_v19 }
 0x2bc   :  { %1102 = vmatpush.msrb.mxu2 %v2170_v2  ;;  %1122 = vmatpush.msrb.mxu3 %v2212_v46  ;;  %v2895_v2 = vld [vmem:[#allocation29_spill] sm:$0xff] }
 0x2bd   :  { %1018 = vmatpush.msra.mxu1 %v2281_v20 }
 0x2be   :  { %1103 = vmatpush.msrb.mxu2 %v2173_v6  ;;  %1123 = vmatpush.msrb.mxu3 %v2218_v51 }
 0x2bf   :  { %1019 = vmatpush.msra.mxu1 %v2286_v22 }
 0x2c0   :  { %1104 = vmatpush.msrb.mxu2 %v2176_v11  ;;  %1124 = vmatpush.msrb.mxu3 %v2223_v56  ;;  %v2896_v11 = vld [vmem:[#allocation32_spill] sm:$0xff] }
 0x2c1   :  { %1020 = vmatpush.msra.mxu1 %v2291_v23 }
 0x2c2   :  { %1105 = vmatpush.msrb.mxu2 %v2179_v16  ;;  %1125 = vmatpush.msrb.mxu3 %v2228_v60 }
 0x2c3   :  { %1021 = vmatpush.msra.mxu1 %v2296_v24 }
 0x2c4   :  { %1106 = vmatpush.msrb.mxu2 %v2182_v21  ;;  %1126 = vmatpush.msrb.mxu3 %v2232_v1 }
 0x2c5   :  { %1022 = vmatpush.msra.mxu1 %v2301_v26 }
 0x2c6   :  { %1107 = vmatpush.msrb.mxu2 %v2185_v25  ;;  %1127 = vmatpush.msrb.mxu3 %v2236_v5  ;;  %v2897_v25 = vld [vmem:[#allocation33_spill] sm:$0xff] }
 0x2c7   :  { %1023 = vmatpush.msra.mxu1 %v2306_v27 }
 0x2c8   :  { %1108 = vmatpush.msrb.mxu2 %v2204_v39  ;;  %1128 = vmatpush.msrb.mxu3 %v2243_v8 }
 0x2c9   :  { %1024 = vmatpush.msra.mxu1 %v2311_v30 }
 0x2ca   :  { %1109 = vmatpush.msrb.mxu2 %v2210_v43  ;;  %1129 = vmatpush.msrb.mxu3 %v2881_v44 }
 0x2cb   :  { %1025 = vmatpush.msra.mxu1 %v2882_v45 }
 0x2cc   :  { %1110 = vmatpush.msrb.mxu2 %v2883_v47  ;;  %1130 = vmatpush.msrb.mxu3 %v2884_v53 }
 0x2cd   :  { %1026 = vmatpush.msra.mxu1 %v2893_v57 }
 0x2ce   :  { %1111 = vmatpush.msrb.mxu2 %v2894_v61  ;;  %1131 = vmatpush.msrb.mxu3 %v2895_v2 }
 0x32b   :  { %v738_v6 = vpop.f32.mrf.mxu1 }
 0x32c   :  { %v739_v16 = vadd.f32 %v738_v6, %v2896_v11 }
 0x32e   :  { %v782_v21 = vrot.slane %v739_v16, 6 }
 0x330   :  { %v784_v32 = vadd.f32 %v782_v21, %v2897_v25 }
 0x331   :  { %v758_v34 = vpop.f32.mrf.mxu2 }
 0x332   :  { %v1604_v35 = vmul.f32 -1.442695, %v784_v32  ;;  %v759_v37 = vadd.f32 %v758_v34, %v2898_v36  ;;  %v778_v58 = vpop.f32.mrf.mxu3 }
 0x333   :  { %v779_v63 = vadd.f32 %v778_v58, %v2900_v62  ;;  %v2612_v58 = vld [vmem:[#allocation14 + $0xf0] sm:$0xff] }
 0x334   :  { %1656 = vpow2.f32 %v1604_v35  ;;  %v805_v39 = vrot.slane %v759_v37, 6 }
 0x335   :  { %v828_v49 = vrot.slane %v779_v63, 6  ;;  %v2636_v63 = vld [vmem:[#allocation14 + $0xb0] sm:$0xff] }
 0x336   :  { %v807_v43 = vadd.f32 %v805_v39, %v2899_v40 }
 0x338   :  { %v1605_v46 = vmul.f32 -1.442695, %v807_v43 }
 0x33a   :  { %v1657_v51 = vpop.eup %1656  ;;  %1658 = vpow2.f32 %v1605_v46 }
 0x33b   :  { %v788_v56 = vadd.f32 1.0, %v1657_v51 }
 0x33d   :  { %1660 = vrcp.f32 %v788_v56  ;;  %v800_v4 = vand.u32 2147483648, %v788_v56  ;;  %v798_v38 = vand.u32 2147483647, %v788_v56  ;;  %vm794_vm2 = vweird.f32 %v788_v56 }
 0x33f   :  { %v801_v59 = vor.u32 1.1754944e-38, %v800_v4  ;;  %vm799_vm4 = vcmp.eq.f32.partialorder %v798_v38, 8.507059e+37  ;;  %v2629_v4 = vld [vmem:[#allocation14 + $0xc8] sm:$0xff]  ;;  %v2650_v38 = vld [vmem:[#allocation14 + $0x80] sm:$0xff] }
 0x340   :  { %v1659_v60 = vpop.eup %1658 }
 0x341   :  { %v811_v1 = vadd.f32 1.0, %v1659_v60 }
 0x343   :  { %v1661_v47 = vpop.eup %1660  ;;  %1662 = vrcp.f32 %v811_v1  ;;  %v823_v32 = vand.u32 2147483648, %v811_v1  ;;  %vm817_vm6 = vweird.f32 %v811_v1  ;;  %v821_v35 = vand.u32 2147483647, %v811_v1 }
 0x344   :  { %v790_v29 = vmul.f32 %v1661_v47, %v788_v56  ;;  %vm795_vm1 = vweird.f32 %v1661_v47 }
 0x345   :  { %vm796_vm3 = vmor %vm794_vm2, %vm795_vm1  ;;  %v824_v43 = vor.u32 1.1754944e-38, %v823_v32  ;;  %vm822_vm8 = vcmp.eq.f32.partialorder %v821_v35, 8.507059e+37 }
 0x346   :  { %v791_v33 = vsub.f32 1.0, %v790_v29  ;;  %v2596_v29 = vld [vmem:[#allocation14 + $0x140] sm:$0xff] }
 0x348   :  { %v792_v48 = vmul.f32 %v1661_v47, %v791_v33  ;;  %v2622_v33 = vld [vmem:[#allocation14 + $0xe0] sm:$0xff] }
 0x349   :  { %v1663_v3 = vpop.eup %1662 }
 0x34a   :  { %v793_v13 = vadd.f32 %v1661_v47, %v792_v48  ;;  %v813_v15 = vmul.f32 %v1663_v3, %v811_v1  ;;  %vm818_vm5 = vweird.f32 %v1663_v3  ;;  %v2591_v1 = vld [vmem:[#allocation14 + $0x158] sm:$0xff] }
 0x34b   :  { %vm819_vm7 = vmor %vm817_vm6, %vm818_vm5  ;;  %v2643_v48 = vld [vmem:[#allocation14 + $0x98] sm:$0xff] }
 0x34c   :  { %v797_v0 = vsel %vm796_vm3, %v1661_v47, %v793_v13  ;;  %v814_v10 = vsub.f32 1.0, %v813_v15 }
 0x34d   :  { %v802_v28 = vsel %vm799_vm4, %v801_v59, %v797_v0 }
 0x34e   :  { %v830_v52 = vmul.f32 %v828_v49, %v802_v28  ;;  %v815_v6 = vmul.f32 %v1663_v3, %v814_v10 }
 0x350   :  { %v831_v61 = vadd.f32 %v830_v52, %v2449_v50  ;;  %v816_v16 = vadd.f32 %v1663_v3, %v815_v6 }
 0x352   :  { %1664 = vtanh.f32 %v831_v61  ;;  %v820_v39 = vsel %vm819_vm7, %v1663_v3, %v816_v16  ;;  %v2659_v3 = vld [vmem:[#allocation14 + $0x48] sm:$0xff] }
 0x353   :  { %v825_v51 = vsel %vm822_vm8, %v824_v43, %v820_v39 }
 0x358   :  { %v1665_v21 = vpop.eup %1664 }
 0x359   :  { %v834_v34 = vrot.slane %v1665_v21, 1 }
 0x35b   :  { %v836_v37 = vsub.f32 %v2513_v54, %v834_v34  ;;  %v2586_v54 = vld [vmem:[#allocation14 + $0x170] sm:$0xff] }
 0x35d   :  { %v838_v46 = vrot.slane %v836_v37, 7 }
 0x35f   :  { %v840_v56 = vmul.f32 %v838_v46, %v825_v51 }
 0x361   :  { %v2580_v60 = vadd.f32 %v1665_v21, %v840_v56 }
 0x363   :  { %842 = vst [vmem:[#allocation2] sm:$0x4] %v2580_v60  ;;  %v844_v47 = vrot.slane %v2580_v60, 2 }
 0x365   :  { %862 = vmatmul.f32.vlgmr.msrb.gmra.mxu0 %v844_v47  ;;  %882 = vmatmul.f32.vlgmr.msrb.gmra.mxu1 %v844_v47 }
 0x366   :  { %902 = vmatmul.f32.vlgmr.msra.gmra.mxu2 %v844_v47  ;;  %1136 = vmatpush.msrb.mxu0 %v2238_v7  ;;  %v2601_v7 = vld [vmem:[#allocation14 + $0x128] sm:$0xff] }
 0x367   :  { %1221 = vmatpush.msrb.mxu1 %v2518_v31  ;;  %1241 = vmatpush.msra.mxu2 %v2586_v54 }
 0x368   :  { %1137 = vmatpush.msrb.mxu0 %v2245_v9  ;;  %v2605_v9 = vld [vmem:[#allocation14 + $0x108] sm:$0xff] }
 0x369   :  { %1222 = vmatpush.msrb.mxu1 %v2523_v42  ;;  %1242 = vmatpush.msra.mxu2 %v2591_v1 }
 0x36a   :  { %1138 = vmatpush.msrb.mxu0 %v2252_v12  ;;  %v2608_v12 = vld [vmem:[#allocation14 + $0x110] sm:$0xff] }
 0x36b   :  { %1223 = vmatpush.msrb.mxu1 %v2528_v55  ;;  %1243 = vmatpush.msra.mxu2 %v2596_v29 }
 0x36c   :  { %1139 = vmatpush.msrb.mxu0 %v2256_v14  ;;  %v2615_v14 = vld [vmem:[#allocation14 + $0xf8] sm:$0xff] }
 0x36d   :  { %1224 = vmatpush.msrb.mxu1 %v2533_v41  ;;  %1244 = vmatpush.msra.mxu2 %v2601_v7 }
 0x36e   :  { %1140 = vmatpush.msrb.mxu0 %v2264_v17  ;;  %v2619_v17 = vld [vmem:[#allocation14 + $0xd8] sm:$0xff] }
 0x36f   :  { %1225 = vmatpush.msrb.mxu1 %v2605_v9  ;;  %1245 = vmatpush.msra.mxu2 %v2608_v12 }
 0x370   :  { %1141 = vmatpush.msrb.mxu0 %v2274_v18  ;;  %v2626_v18 = vld [vmem:[#allocation14 + $0xc0] sm:$0xff] }
 0x371   :  { %1226 = vmatpush.msrb.mxu1 %v2612_v58  ;;  %1246 = vmatpush.msra.mxu2 %v2615_v14 }
 0x372   :  { %1142 = vmatpush.msrb.mxu0 %v2276_v19  ;;  %v2633_v19 = vld [vmem:[#allocation14 + $0xa8] sm:$0xff] }
 0x373   :  { %1227 = vmatpush.msrb.mxu1 %v2619_v17  ;;  %1247 = vmatpush.msra.mxu2 %v2622_v33 }
 0x374   :  { %1143 = vmatpush.msrb.mxu0 %v2281_v20  ;;  %v2640_v20 = vld [vmem:[#allocation14 + $0x90] sm:$0xff] }
 0x375   :  { %1228 = vmatpush.msrb.mxu1 %v2626_v18  ;;  %1248 = vmatpush.msra.mxu2 %v2629_v4 }
 0x376   :  { %1144 = vmatpush.msrb.mxu0 %v2286_v22  ;;  %v2647_v22 = vld [vmem:[#allocation14 + $0x78] sm:$0xff] }
 0x377   :  { %1229 = vmatpush.msrb.mxu1 %v2633_v19  ;;  %1249 = vmatpush.msra.mxu2 %v2636_v63 }
 0x378   :  { %1145 = vmatpush.msrb.mxu0 %v2291_v23  ;;  %v2654_v23 = vld [vmem:[#allocation14 + $0x60] sm:$0xff] }
 0x379   :  { %1230 = vmatpush.msrb.mxu1 %v2640_v20  ;;  %1250 = vmatpush.msra.mxu2 %v2643_v48 }
 0x37a   :  { %1146 = vmatpush.msrb.mxu0 %v2296_v24  ;;  %v2664_v24 = vld [vmem:[#allocation14 + $0x30] sm:$0xff] }
 0x37b   :  { %1231 = vmatpush.msrb.mxu1 %v2647_v22  ;;  %1251 = vmatpush.msra.mxu2 %v2650_v38 }
 0x37c   :  { %1147 = vmatpush.msrb.mxu0 %v2301_v26  ;;  %v2669_v26 = vld [vmem:[#allocation14 + $0x18] sm:$0xff] }
 0x37d   :  { %1232 = vmatpush.msrb.mxu1 %v2654_v23  ;;  %1252 = vmatpush.msra.mxu2 %v2236_v5  ;;  %v2674_v5 = vld [vmem:[#allocation14] sm:$0xff] }
 0x37e   :  { %1148 = vmatpush.msrb.mxu0 %v2306_v27 }
 0x37f   :  { %1233 = vmatpush.msrb.mxu1 %v2659_v3  ;;  %1253 = vmatpush.msra.mxu2 %v2243_v8 }
 0x380   :  { %1149 = vmatpush.msrb.mxu0 %v2311_v30 }
 0x381   :  { %1234 = vmatpush.msrb.mxu1 %v2664_v24  ;;  %1254 = vmatpush.msra.mxu2 %v2881_v44 }
 0x382   :  { %1150 = vmatpush.msrb.mxu0 %v2882_v45 }
 0x383   :  { %1235 = vmatpush.msrb.mxu1 %v2669_v26  ;;  %1255 = vmatpush.msra.mxu2 %v2884_v53 }
 0x384   :  { %1151 = vmatpush.msrb.mxu0 %v2893_v57 }
 0x385   :  { %1236 = vmatpush.msrb.mxu1 %v2674_v5  ;;  %1256 = vmatpush.msra.mxu2 %v2895_v2 }
 0x3e2   :  { %v863_v8 = vpop.f32.mrf.mxu0  ;;  %v883_v27 = vpop.f32.mrf.mxu1 }
 0x3e3   :  { %v864_v30 = vadd.f32 %v863_v8, %v2896_v11  ;;  %v884_v44 = vadd.f32 %v883_v27, %v2898_v36 }
 0x3e5   :  { %v907_v45 = vrot.slane %v864_v30, 5  ;;  %v930_v13 = vrot.slane %v884_v44, 5 }
 0x3e7   :  { %v909_v15 = vadd.f32 %v907_v45, %v2897_v25  ;;  %v932_v53 = vadd.f32 %v930_v13, %v2899_v40 }
 0x3e9   :  { %v1606_v59 = vmul.f32 -1.442695, %v909_v15  ;;  %v1607_v57 = vmul.f32 -1.442695, %v932_v53  ;;  %v903_v61 = vpop.f32.mrf.mxu2 }
 0x3ea   :  { %v904_v32 = vadd.f32 %v903_v61, %v2900_v62 }
 0x3eb   :  { %1666 = vpow2.f32 %v1606_v59 }
 0x3ec   :  { %1668 = vpow2.f32 %v1607_v57  ;;  %v953_v51 = vrot.slane %v904_v32, 5 }
 0x3f1   :  { %v1667_v0 = vpop.eup %1666 }
 0x3f2   :  { %v1669_v49 = vpop.eup %1668  ;;  %v913_v28 = vadd.f32 1.0, %v1667_v0 }
 0x3f3   :  { %v936_v2 = vadd.f32 1.0, %v1669_v49 }
 0x3f4   :  { %1670 = vrcp.f32 %v913_v28  ;;  %v925_v16 = vand.u32 2147483648, %v913_v28  ;;  %v923_v35 = vand.u32 2147483647, %v913_v28  ;;  %vm919_vm10 = vweird.f32 %v913_v28 }
 0x3f5   :  { %1672 = vrcp.f32 %v936_v2  ;;  %v948_v13 = vand.u32 2147483648, %v936_v2  ;;  %vm942_vm14 = vweird.f32 %v936_v2  ;;  %v946_v53 = vand.u32 2147483647, %v936_v2 }
 0x3f6   :  { %v926_v43 = vor.u32 1.1754944e-38, %v925_v16  ;;  %vm924_vm12 = vcmp.eq.f32.partialorder %v923_v35, 8.507059e+37  ;;  %v2704_v16 = vld [vmem:[#allocation14 + $0x130] sm:$0xff] }
 0x3f7   :  { %v949_v0 = vor.u32 1.1754944e-38, %v948_v13  ;;  %vm947_vm0 = vcmp.eq.f32.partialorder %v946_v53, 8.507059e+37 }
 0x3fa   :  { %v1671_v52 = vpop.eup %1670 }
 0x3fb   :  { %v915_v10 = vmul.f32 %v1671_v52, %v913_v28  ;;  %v1673_v21 = vpop.eup %1672  ;;  %vm920_vm9 = vweird.f32 %v1671_v52 }
 0x3fc   :  { %v938_v39 = vmul.f32 %v1673_v21, %v936_v2  ;;  %vm921_vm11 = vmor %vm919_vm10, %vm920_vm9  ;;  %vm943_vm13 = vweird.f32 %v1673_v21  ;;  %v2699_v2 = vld [vmem:[#allocation14 + $0x148] sm:$0xff] }
 0x3fd   :  { %v916_v6 = vsub.f32 1.0, %v915_v10  ;;  %vm944_vm15 = vmor %vm942_vm14, %vm943_vm13 }
 0x3fe   :  { %v939_v8 = vsub.f32 1.0, %v938_v39 }
 0x3ff   :  { %v917_v34 = vmul.f32 %v1671_v52, %v916_v6  ;;  %v2689_v6 = vld [vmem:[#allocation14 + $0x178] sm:$0xff] }
 0x400   :  { %v940_v30 = vmul.f32 %v1673_v21, %v939_v8 }
 0x401   :  { %v918_v37 = vadd.f32 %v1671_v52, %v917_v34 }
 0x402   :  { %v941_v44 = vadd.f32 %v1673_v21, %v940_v30 }
 0x403   :  { %v922_v46 = vsel %vm921_vm11, %v1671_v52, %v918_v37 }
 0x404   :  { %v927_v56 = vsel %vm924_vm12, %v926_v43, %v922_v46  ;;  %v945_v57 = vsel %vm944_vm15, %v1673_v21, %v941_v44 }
 0x405   :  { %v955_v47 = vmul.f32 %v953_v51, %v927_v56  ;;  %v950_v28 = vsel %vm947_vm0, %v949_v0, %v945_v57 }
 0x407   :  { %v956_v27 = vadd.f32 %v955_v47, %v2449_v50 }
 0x409   :  { %1674 = vtanh.f32 %v956_v27 }
 0x40f   :  { %v1675_v45 = vpop.eup %1674 }
 0x410   :  { %v959_v15 = vrot.slane %v1675_v45, 1 }
 0x412   :  { %v961_v59 = vsub.f32 %v2580_v60, %v959_v15  ;;  %v2694_v60 = vld [vmem:[#allocation14 + $0x160] sm:$0xff] }
 0x414   :  { %v963_v49 = vrot.slane %v961_v59, 7 }
 0x416   :  { %v965_v52 = vmul.f32 %v963_v49, %v950_v28 }
 0x418   :  { %v2685_v10 = vadd.f32 %v1675_v45, %v965_v52 }
 0x41a   :  { %967 = vst [vmem:[#allocation2] sm:$0x8] %v2685_v10  ;;  %v969_v61 = vrot.slane %v2685_v10, 3 }
 0x41c   :  { %987 = vmatmul.f32.vlgmr.msra.gmra.mxu3 %v969_v61  ;;  %1007 = vmatmul.f32.vlgmr.msra.gmra.mxu0 %v969_v61 }
 0x41d   :  { %1027 = vmatmul.f32.vlgmr.msra.gmra.mxu1 %v969_v61  ;;  %1261 = vmatpush.msra.mxu3 %v2689_v6 }
 0x41e   :  { %1346 = vmatpush.msra.mxu0 %v2518_v31  ;;  %1366 = vmatpush.msra.mxu1 %v2586_v54  ;;  %v2709_v31 = vld [vmem:[#allocation14 + $0x118] sm:$0xff] }
 0x41f   :  { %1262 = vmatpush.msra.mxu3 %v2694_v60  ;;  %v2729_v54 = vld [vmem:[#allocation14 + $0xb8] sm:$0xff] }
 0x420   :  { %1347 = vmatpush.msra.mxu0 %v2523_v42  ;;  %1367 = vmatpush.msra.mxu1 %v2591_v1  ;;  %v2714_v42 = vld [vmem:[#allocation14 + $0x100] sm:$0xff] }
 0x421   :  { %1263 = vmatpush.msra.mxu3 %v2699_v2  ;;  %v2734_v1 = vld [vmem:[#allocation14 + $0xa0] sm:$0xff] }
 0x422   :  { %1348 = vmatpush.msra.mxu0 %v2528_v55  ;;  %1368 = vmatpush.msra.mxu1 %v2596_v29  ;;  %v2719_v55 = vld [vmem:[#allocation14 + $0xe8] sm:$0xff] }
 0x423   :  { %1264 = vmatpush.msra.mxu3 %v2704_v16  ;;  %v2739_v29 = vld [vmem:[#allocation14 + $0x88] sm:$0xff] }
 0x424   :  { %1349 = vmatpush.msra.mxu0 %v2533_v41  ;;  %1369 = vmatpush.msra.mxu1 %v2601_v7  ;;  %v2724_v41 = vld [vmem:[#allocation14 + $0xd0] sm:$0xff] }
 0x425   :  { %1265 = vmatpush.msra.mxu3 %v2709_v31  ;;  %v2744_v7 = vld [vmem:[#allocation14 + $0x70] sm:$0xff] }
 0x426   :  { %1350 = vmatpush.msra.mxu0 %v2605_v9  ;;  %1370 = vmatpush.msra.mxu1 %v2608_v12  ;;  %v1761_v9 = vld [vmem:[#allocation14 + $0x68] sm:$0xff]  ;;  %v2748_v12 = vld [vmem:[#allocation14 + $0x58] sm:$0xff] }
 0x427   :  { %1266 = vmatpush.msra.mxu3 %v2714_v42 }
 0x428   :  { %1351 = vmatpush.msra.mxu0 %v2612_v58  ;;  %1371 = vmatpush.msra.mxu1 %v2615_v14  ;;  %v1763_v58 = vld [vmem:[#allocation14 + $0x50] sm:$0xff]  ;;  %v2752_v14 = vld [vmem:[#allocation14 + $0x40] sm:$0xff] }
 0x429   :  { %1267 = vmatpush.msra.mxu3 %v2719_v55 }
 0x42a   :  { %1352 = vmatpush.msra.mxu0 %v2619_v17  ;;  %1372 = vmatpush.msra.mxu1 %v2622_v33  ;;  %v1765_v17 = vld [vmem:[#allocation14 + $0x38] sm:$0xff]  ;;  %v2756_v33 = vld [vmem:[#allocation14 + $0x28] sm:$0xff] }
 0x42b   :  { %1268 = vmatpush.msra.mxu3 %v2724_v41 }
 0x42c   :  { %1353 = vmatpush.msra.mxu0 %v2626_v18  ;;  %1373 = vmatpush.msra.mxu1 %v2629_v4  ;;  %v1767_v18 = vld [vmem:[#allocation14 + $0x20] sm:$0xff]  ;;  %v2760_v4 = vld [vmem:[#allocation14 + $0x10] sm:$0xff] }
 0x42d   :  { %1269 = vmatpush.msra.mxu3 %v2729_v54 }
 0x42e   :  { %1354 = vmatpush.msra.mxu0 %v2633_v19  ;;  %1374 = vmatpush.msra.mxu1 %v2636_v63  ;;  %v1769_v19 = vld [vmem:[#allocation14 + $0x8] sm:$0xff] }
 0x42f   :  { %1270 = vmatpush.msra.mxu3 %v2734_v1 }
 0x430   :  { %1355 = vmatpush.msra.mxu0 %v2640_v20  ;;  %1375 = vmatpush.msra.mxu1 %v2643_v48 }
 0x431   :  { %1271 = vmatpush.msra.mxu3 %v2739_v29 }
 0x432   :  { %1356 = vmatpush.msra.mxu0 %v2647_v22  ;;  %1376 = vmatpush.msra.mxu1 %v2650_v38 }
 0x433   :  { %1272 = vmatpush.msra.mxu3 %v2744_v7 }
 0x434   :  { %1357 = vmatpush.msra.mxu0 %v2654_v23  ;;  %1377 = vmatpush.msra.mxu1 %v1761_v9 }
 0x435   :  { %1273 = vmatpush.msra.mxu3 %v2748_v12 }
 0x436   :  { %1358 = vmatpush.msra.mxu0 %v2659_v3  ;;  %1378 = vmatpush.msra.mxu1 %v1763_v58 }
 0x437   :  { %1274 = vmatpush.msra.mxu3 %v2752_v14 }
 0x438   :  { %1359 = vmatpush.msra.mxu0 %v2664_v24  ;;  %1379 = vmatpush.msra.mxu1 %v1765_v17 }
 0x439   :  { %1275 = vmatpush.msra.mxu3 %v2756_v33 }
 0x43a   :  { %1360 = vmatpush.msra.mxu0 %v2669_v26  ;;  %1380 = vmatpush.msra.mxu1 %v1767_v18 }
 0x43b   :  { %1276 = vmatpush.msra.mxu3 %v2760_v4 }
 0x43c   :  { %1361 = vmatpush.msra.mxu0 %v2674_v5  ;;  %1381 = vmatpush.msra.mxu1 %v1769_v19 }
 0x499   :  { %v1008_v63 = vpop.f32.mrf.mxu0 }
 0x49a   :  { %v1009_v20 = vadd.f32 %v1008_v63, %v2898_v36  ;;  %v1028_v43 = vpop.f32.mrf.mxu1 }
 0x49b   :  { %v1029_v47 = vadd.f32 %v1028_v43, %v2900_v62 }
 0x49c   :  { %v1055_v48 = vrot.slane %v1009_v20, 4 }
 0x49d   :  { %v1078_v13 = vrot.slane %v1029_v47, 4 }
 0x49e   :  { %v1057_v23 = vadd.f32 %v1055_v48, %v2899_v40 }
 0x49f   :  { %v988_v22 = vpop.f32.mrf.mxu3 }
 0x4a0   :  { %v989_v38 = vadd.f32 %v988_v22, %v2896_v11  ;;  %v1609_v26 = vmul.f32 -1.442695, %v1057_v23 }
 0x4a2   :  { %v1032_v3 = vrot.slane %v989_v38, 4 }
 0x4a4   :  { %v1034_v24 = vadd.f32 %v1032_v3, %v2897_v25 }
 0x4a6   :  { %v1608_v21 = vmul.f32 -1.442695, %v1034_v24 }
 0x4a8   :  { %1676 = vpow2.f32 %v1608_v21 }
 0x4a9   :  { %1678 = vpow2.f32 %v1609_v26 }
 0x4ae   :  { %v1677_v32 = vpop.eup %1676 }
 0x4af   :  { %v1679_v5 = vpop.eup %1678  ;;  %v1038_v34 = vadd.f32 1.0, %v1677_v32 }
 0x4b0   :  { %v1061_v35 = vadd.f32 1.0, %v1679_v5 }
 0x4b1   :  { %1680 = vrcp.f32 %v1038_v34  ;;  %v1050_v51 = vand.u32 2147483648, %v1038_v34  ;;  %v1048_v27 = vand.u32 2147483647, %v1038_v34  ;;  %vm1044_vm2 = vweird.f32 %v1038_v34 }
 0x4b2   :  { %1682 = vrcp.f32 %v1061_v35  ;;  %v1073_v61 = vand.u32 2147483648, %v1061_v35  ;;  %vm1067_vm6 = vweird.f32 %v1061_v35  ;;  %v1071_v9 = vand.u32 2147483647, %v1061_v35 }
 0x4b3   :  { %v1051_v45 = vor.u32 1.1754944e-38, %v1050_v51  ;;  %vm1049_vm4 = vcmp.eq.f32.partialorder %v1048_v27, 8.507059e+37 }
 0x4b4   :  { %v1074_v19 = vor.u32 1.1754944e-38, %v1073_v61  ;;  %vm1072_vm8 = vcmp.eq.f32.partialorder %v1071_v9, 8.507059e+37 }
 0x4b7   :  { %v1681_v37 = vpop.eup %1680 }
 0x4b8   :  { %v1040_v39 = vmul.f32 %v1681_v37, %v1038_v34  ;;  %v1683_v56 = vpop.eup %1682  ;;  %vm1045_vm1 = vweird.f32 %v1681_v37 }
 0x4b9   :  { %v1063_v44 = vmul.f32 %v1683_v56, %v1061_v35  ;;  %vm1046_vm3 = vmor %vm1044_vm2, %vm1045_vm1  ;;  %vm1068_vm5 = vweird.f32 %v1683_v56 }
 0x4ba   :  { %v1041_v46 = vsub.f32 1.0, %v1040_v39  ;;  %vm1069_vm7 = vmor %vm1067_vm6, %vm1068_vm5 }
 0x4bb   :  { %v1064_v57 = vsub.f32 1.0, %v1063_v44 }
 0x4bc   :  { %v1042_v8 = vmul.f32 %v1681_v37, %v1041_v46 }
 0x4bd   :  { %v1065_v49 = vmul.f32 %v1683_v56, %v1064_v57 }
 0x4be   :  { %v1043_v30 = vadd.f32 %v1681_v37, %v1042_v8 }
 0x4bf   :  { %v1066_v28 = vadd.f32 %v1683_v56, %v1065_v49 }
 0x4c0   :  { %v1047_v15 = vsel %vm1046_vm3, %v1681_v37, %v1043_v30 }
 0x4c1   :  { %v1052_v53 = vsel %vm1049_vm4, %v1051_v45, %v1047_v15  ;;  %v1070_v17 = vsel %vm1069_vm7, %v1683_v56, %v1066_v28 }
 0x4c2   :  { %v1080_v59 = vmul.f32 %v1078_v13, %v1052_v53  ;;  %v1075_v20 = vsel %vm1072_vm8, %v1074_v19, %v1070_v17 }
 0x4c4   :  { %v1081_v0 = vadd.f32 %v1080_v59, %v2449_v50 }
 0x4c6   :  { %1684 = vtanh.f32 %v1081_v0 }
 0x4cc   :  { %v1685_v52 = vpop.eup %1684 }
 0x4cd   :  { %v1084_v58 = vrot.slane %v1685_v52, 1 }
 0x4cf   :  { %v1086_v18 = vsub.f32 %v2685_v10, %v1084_v58 }
 0x4d1   :  { %v1088_v63 = vrot.slane %v1086_v18, 7 }
 0x4d3   :  { %v1090_v48 = vmul.f32 %v1088_v63, %v1075_v20 }
 0x4d5   :  { %v2771_v22 = vadd.f32 %v1685_v52, %v1090_v48 }
 0x4d7   :  { %1092 = vst [vmem:[#allocation2] sm:$0x10] %v2771_v22  ;;  %v1094_v38 = vrot.slane %v2771_v22, 4 }
 0x4d9   :  { %1112 = vmatmul.f32.vlgmr.msrb.gmra.mxu2 %v1094_v38  ;;  %1132 = vmatmul.f32.vlgmr.msrb.gmra.mxu3 %v1094_v38 }
 0x4da   :  { %1152 = vmatmul.f32.vlgmr.msrb.gmra.mxu0 %v1094_v38  ;;  %1386 = vmatpush.msrb.mxu2 %v2689_v6 }
 0x4dc   :  { %1387 = vmatpush.msrb.mxu2 %v2694_v60 }
 0x4de   :  { %1388 = vmatpush.msrb.mxu2 %v2699_v2 }
 0x4e0   :  { %1389 = vmatpush.msrb.mxu2 %v2704_v16 }
 0x4e2   :  { %1390 = vmatpush.msrb.mxu2 %v2709_v31 }
 0x4e4   :  { %1391 = vmatpush.msrb.mxu2 %v2714_v42 }
 0x4e6   :  { %1392 = vmatpush.msrb.mxu2 %v2719_v55 }
 0x4e8   :  { %1393 = vmatpush.msrb.mxu2 %v2724_v41 }
 0x4ea   :  { %1394 = vmatpush.msrb.mxu2 %v2729_v54 }
 0x4ec   :  { %1395 = vmatpush.msrb.mxu2 %v2734_v1 }
 0x4ee   :  { %1396 = vmatpush.msrb.mxu2 %v2739_v29 }
 0x4f0   :  { %1397 = vmatpush.msrb.mxu2 %v2744_v7 }
 0x4f2   :  { %1398 = vmatpush.msrb.mxu2 %v2748_v12 }
 0x4f4   :  { %1399 = vmatpush.msrb.mxu2 %v2752_v14 }
 0x4f6   :  { %1400 = vmatpush.msrb.mxu2 %v2756_v33 }
 0x4f8   :  { %1401 = vmatpush.msrb.mxu2 %v2760_v4 }
 0x557   :  { %v1153_v4 = vpop.f32.mrf.mxu0 }
 0x558   :  { %v1154_v26 = vadd.f32 %v1153_v4, %v2900_v62 }
 0x55a   :  { %v1203_v37 = vrot.slane %v1154_v26, 3 }
 0x55c   :  { %v1113_v10 = vpop.f32.mrf.mxu2  ;;  %v1133_v6 = vpop.f32.mrf.mxu3 }
 0x55d   :  { %v1114_v60 = vadd.f32 %v1113_v10, %v2896_v11  ;;  %v1134_v2 = vadd.f32 %v1133_v6, %v2898_v36 }
 0x55f   :  { %v1157_v16 = vrot.slane %v1114_v60, 3  ;;  %v1180_v31 = vrot.slane %v1134_v2, 3 }
 0x561   :  { %v1159_v42 = vadd.f32 %v1157_v16, %v2897_v25  ;;  %v1182_v55 = vadd.f32 %v1180_v31, %v2899_v40 }
 0x563   :  { %v1610_v41 = vmul.f32 -1.442695, %v1159_v42  ;;  %v1611_v54 = vmul.f32 -1.442695, %v1182_v55 }
 0x565   :  { %1686 = vpow2.f32 %v1610_v41 }
 0x566   :  { %1688 = vpow2.f32 %v1611_v54 }
 0x56b   :  { %v1687_v1 = vpop.eup %1686 }
 0x56c   :  { %v1689_v29 = vpop.eup %1688  ;;  %v1163_v7 = vadd.f32 1.0, %v1687_v1 }
 0x56d   :  { %v1186_v12 = vadd.f32 1.0, %v1689_v29 }
 0x56e   :  { %1690 = vrcp.f32 %v1163_v7  ;;  %v1175_v3 = vand.u32 2147483648, %v1163_v7  ;;  %v1173_v32 = vand.u32 2147483647, %v1163_v7  ;;  %vm1169_vm10 = vweird.f32 %v1163_v7 }
 0x56f   :  { %1692 = vrcp.f32 %v1186_v12  ;;  %v1198_v30 = vand.u32 2147483648, %v1186_v12  ;;  %vm1192_vm14 = vweird.f32 %v1186_v12  ;;  %v1196_v44 = vand.u32 2147483647, %v1186_v12 }
 0x570   :  { %v1176_v34 = vor.u32 1.1754944e-38, %v1175_v3  ;;  %vm1174_vm12 = vcmp.eq.f32.partialorder %v1173_v32, 8.507059e+37 }
 0x571   :  { %v1199_v53 = vor.u32 1.1754944e-38, %v1198_v30  ;;  %vm1197_vm0 = vcmp.eq.f32.partialorder %v1196_v44, 8.507059e+37 }
 0x574   :  { %v1691_v14 = vpop.eup %1690 }
 0x575   :  { %v1165_v33 = vmul.f32 %v1691_v14, %v1163_v7  ;;  %v1693_v24 = vpop.eup %1692  ;;  %vm1170_vm9 = vweird.f32 %v1691_v14 }
 0x576   :  { %vm1171_vm11 = vmor %vm1169_vm10, %vm1170_vm9  ;;  %v1188_v35 = vmul.f32 %v1693_v24, %v1186_v12  ;;  %vm1193_vm13 = vweird.f32 %v1693_v24 }
 0x577   :  { %v1166_v23 = vsub.f32 1.0, %v1165_v33  ;;  %vm1194_vm15 = vmor %vm1192_vm14, %vm1193_vm13 }
 0x578   :  { %v1189_v51 = vsub.f32 1.0, %v1188_v35 }
 0x579   :  { %v1167_v21 = vmul.f32 %v1691_v14, %v1166_v23 }
 0x57a   :  { %v1190_v47 = vmul.f32 %v1693_v24, %v1189_v51 }
 0x57b   :  { %v1168_v5 = vadd.f32 %v1691_v14, %v1167_v21 }
 0x57c   :  { %v1191_v8 = vadd.f32 %v1693_v24, %v1190_v47 }
 0x57d   :  { %v1172_v39 = vsel %vm1171_vm11, %v1691_v14, %v1168_v5 }
 0x57e   :  { %v1177_v43 = vsel %vm1174_vm12, %v1176_v34, %v1172_v39  ;;  %v1195_v13 = vsel %vm1194_vm15, %v1693_v24, %v1191_v8 }
 0x57f   :  { %v1205_v46 = vmul.f32 %v1203_v37, %v1177_v43  ;;  %v1200_v57 = vsel %vm1197_vm0, %v1199_v53, %v1195_v13  ;;  %v1484_v13 = vld [vmem:[#allocation15 + $0x78] sm:$0xff] }
 0x580   :  { %1489 = vmatpush.msrb.mxu3 %v1484_v13 }
 0x581   :  { %v1206_v56 = vadd.f32 %v1205_v46, %v2449_v50 }
 0x583   :  { %1694 = vtanh.f32 %v1206_v56 }
 0x589   :  { %v1695_v27 = vpop.eup %1694 }
 0x58a   :  { %v1209_v45 = vrot.slane %v1695_v27, 1 }
 0x58c   :  { %v1211_v15 = vsub.f32 %v2771_v22, %v1209_v45 }
 0x58e   :  { %v1213_v59 = vrot.slane %v1211_v15, 7 }
 0x590   :  { %v1215_v0 = vmul.f32 %v1213_v59, %v1200_v57  ;;  %v1483_v59 = vld [vmem:[#allocation15 + $0x70] sm:$0xff] }
 0x591   :  { %1490 = vmatpush.msrb.mxu3 %v1483_v59 }
 0x592   :  { %v1216_v49 = vadd.f32 %v1695_v27, %v1215_v0 }
 0x594   :  { %1217 = vst [vmem:[#allocation2] sm:$0x20] %v1216_v49  ;;  %v1219_v28 = vrot.slane %v1216_v49, 5 }
 0x596   :  { %1237 = vmatmul.f32.vlgmr.msrb.gmra.mxu1 %v1219_v28  ;;  %1257 = vmatmul.f32.vlgmr.msra.gmra.mxu2 %v1219_v28 }
 0x597   :  { %1277 = vmatmul.f32.vlgmr.msra.gmra.mxu3 %v1219_v28 }
 0x613   :  { %v1238_v52 = vpop.f32.mrf.mxu1 }
 0x614   :  { %v1239_v61 = vadd.f32 %v1238_v52, %v2896_v11 }
 0x616   :  { %v1282_v9 = vrot.slane %v1239_v61, 2  ;;  %v1481_v61 = vld [vmem:[#allocation15 + $0x60] sm:$0xff] }
 0x618   :  { %v1284_v58 = vadd.f32 %v1282_v9, %v2897_v25  ;;  %v1478_v9 = vld [vmem:[#allocation15 + $0x48] sm:$0xff] }
 0x619   :  { %v1258_v17 = vpop.f32.mrf.mxu2 }
 0x61a   :  { %v1612_v18 = vmul.f32 -1.442695, %v1284_v58  ;;  %v1259_v19 = vadd.f32 %v1258_v17, %v2898_v36  ;;  %v1278_v16 = vpop.f32.mrf.mxu3  ;;  %v1477_v17 = vld [vmem:[#allocation15 + $0x40] sm:$0xff] }
 0x61b   :  { %v1279_v55 = vadd.f32 %v1278_v16, %v2900_v62  ;;  %v1470_v16 = vld [vmem:[#allocation15 + $0x8] sm:$0xff] }
 0x61c   :  { %1696 = vpow2.f32 %v1612_v18  ;;  %v1305_v63 = vrot.slane %v1259_v19, 2 }
 0x61d   :  { %v1328_v33 = vrot.slane %v1279_v55, 2 }
 0x61e   :  { %v1307_v20 = vadd.f32 %v1305_v63, %v2899_v40  ;;  %v1475_v63 = vld [vmem:[#allocation15 + $0x30] sm:$0xff] }
 0x620   :  { %v1613_v48 = vmul.f32 -1.442695, %v1307_v20  ;;  %v1474_v20 = vld [vmem:[#allocation15 + $0x28] sm:$0xff] }
 0x622   :  { %v1697_v22 = vpop.eup %1696  ;;  %1698 = vpow2.f32 %v1613_v48  ;;  %v1473_v48 = vld [vmem:[#allocation15 + $0x20] sm:$0xff] }
 0x623   :  { %v1288_v38 = vadd.f32 1.0, %v1697_v22 }
 0x625   :  { %1700 = vrcp.f32 %v1288_v38  ;;  %v1300_v42 = vand.u32 2147483648, %v1288_v38  ;;  %v1298_v54 = vand.u32 2147483647, %v1288_v38  ;;  %vm1294_vm2 = vweird.f32 %v1288_v38 }
 0x627   :  { %v1301_v12 = vor.u32 1.1754944e-38, %v1300_v42  ;;  %vm1299_vm4 = vcmp.eq.f32.partialorder %v1298_v54, 8.507059e+37 }
 0x628   :  { %v1699_v10 = vpop.eup %1698 }
 0x629   :  { %v1311_v6 = vadd.f32 1.0, %v1699_v10 }
 0x62b   :  { %v1701_v60 = vpop.eup %1700  ;;  %1702 = vrcp.f32 %v1311_v6  ;;  %v1323_v5 = vand.u32 2147483648, %v1311_v6  ;;  %vm1317_vm6 = vweird.f32 %v1311_v6  ;;  %v1321_v35 = vand.u32 2147483647, %v1311_v6 }
 0x62c   :  { %v1290_v2 = vmul.f32 %v1701_v60, %v1288_v38  ;;  %vm1295_vm1 = vweird.f32 %v1701_v60  ;;  %v1472_v38 = vld [vmem:[#allocation15 + $0x18] sm:$0xff] }
 0x62d   :  { %vm1296_vm3 = vmor %vm1294_vm2, %vm1295_vm1  ;;  %v1324_v43 = vor.u32 1.1754944e-38, %v1323_v5  ;;  %vm1322_vm8 = vcmp.eq.f32.partialorder %v1321_v35, 8.507059e+37  ;;  %v1521_v5 = vld [vmem:[#allocation17 + $0x58] sm:$0xff]  ;;  %v1520_v35 = vld [vmem:[#allocation17 + $0x50] sm:$0xff] }
 0x62e   :  { %v1291_v31 = vsub.f32 1.0, %v1290_v2 }
 0x630   :  { %v1292_v41 = vmul.f32 %v1701_v60, %v1291_v31 }
 0x631   :  { %v1703_v1 = vpop.eup %1702 }
 0x632   :  { %v1293_v29 = vadd.f32 %v1701_v60, %v1292_v41  ;;  %v1313_v7 = vmul.f32 %v1703_v1, %v1311_v6  ;;  %vm1318_vm5 = vweird.f32 %v1703_v1  ;;  %v1471_v6 = vld [vmem:[#allocation15 + $0x10] sm:$0xff] }
 0x633   :  { %vm1319_vm7 = vmor %vm1317_vm6, %vm1318_vm5 }
 0x634   :  { %v1297_v14 = vsel %vm1296_vm3, %v1701_v60, %v1293_v29  ;;  %v1314_v3 = vsub.f32 1.0, %v1313_v7 }
 0x635   :  { %v1302_v4 = vsel %vm1299_vm4, %v1301_v12, %v1297_v14  ;;  %v1525_v14 = vld [vmem:[#allocation17 + $0x78] sm:$0xff] }
 0x636   :  { %v1330_v23 = vmul.f32 %v1328_v33, %v1302_v4  ;;  %v1315_v26 = vmul.f32 %v1703_v1, %v1314_v3  ;;  %v1524_v33 = vld [vmem:[#allocation17 + $0x70] sm:$0xff]  ;;  %1530 = vmatpush.msrb.mxu0 %v1525_v14 }
 0x638   :  { %v1331_v24 = vadd.f32 %v1330_v23, %v2449_v50  ;;  %v1316_v21 = vadd.f32 %v1703_v1, %v1315_v26  ;;  %1531 = vmatpush.msrb.mxu0 %v1524_v33 }
 0x63a   :  { %1704 = vtanh.f32 %v1331_v24  ;;  %v1320_v39 = vsel %vm1319_vm7, %v1703_v1, %v1316_v21  ;;  %v1469_v1 = vld [vmem:[#allocation15] sm:$0xff] }
 0x63b   :  { %v1325_v51 = vsel %vm1322_vm8, %v1324_v43, %v1320_v39  ;;  %v1522_v21 = vld [vmem:[#allocation17 + $0x60] sm:$0xff] }
 0x63c   :  { %v1518_v43 = vld [vmem:[#allocation17 + $0x40] sm:$0xff] }
 0x640   :  { %v1705_v32 = vpop.eup %1704 }
 0x641   :  { %v1334_v34 = vrot.slane %v1705_v32, 1 }
 0x643   :  { %v1336_v37 = vsub.f32 %v1216_v49, %v1334_v34  ;;  %v1482_v49 = vld [vmem:[#allocation15 + $0x68] sm:$0xff] }
 0x644   :  { %1491 = vmatpush.msrb.mxu3 %v1482_v49  ;;  %v1514_v49 = vld [vmem:[#allocation17 + $0x20] sm:$0xff] }
 0x645   :  { %v1338_v46 = vrot.slane %v1336_v37, 7  ;;  %v1519_v37 = vld [vmem:[#allocation17 + $0x48] sm:$0xff] }
 0x646   :  { %1492 = vmatpush.msrb.mxu3 %v1481_v61  ;;  %v1510_v61 = vld [vmem:[#allocation17] sm:$0xff] }
 0x647   :  { %v1340_v56 = vmul.f32 %v1338_v46, %v1325_v51 }
 0x649   :  { %v2804_v47 = vadd.f32 %v1705_v32, %v1340_v56 }
 0x64b   :  { %1342 = vst [vmem:[#allocation2] sm:$0x40] %v2804_v47  ;;  %v1344_v8 = vrot.slane %v2804_v47, 6 }
 0x64d   :  { %1362 = vmatmul.f32.vlgmr.msra.gmra.mxu0 %v1344_v8  ;;  %1382 = vmatmul.f32.vlgmr.msra.gmra.mxu1 %v1344_v8 }
 0x64e   :  { %1402 = vmatmul.f32.vlgmr.msrb.gmra.mxu2 %v1344_v8  ;;  %v1517_v8 = vld [vmem:[#allocation17 + $0x38] sm:$0xff] }
 0x6ca   :  { %v1363_v27 = vpop.f32.mrf.mxu0  ;;  %v1383_v30 = vpop.f32.mrf.mxu1 }
 0x6cb   :  { %v1364_v44 = vadd.f32 %v1363_v27, %v2896_v11  ;;  %v1384_v45 = vadd.f32 %v1383_v30, %v2898_v36  ;;  %v1480_v11 = vld [vmem:[#allocation15 + $0x58] sm:$0xff]  ;;  %v1479_v36 = vld [vmem:[#allocation15 + $0x50] sm:$0xff] }
 0x6cc   :  { %1493 = vmatpush.msrb.mxu3 %v1480_v11  ;;  %v1634_v11 = vld [vmem:[%s2841_s10] ss:$0 sm:$0xff]  ;;  %s2038_s10 = smov [#allocation18]  }
 0x6cd   :  { %v1407_v15 = vrot.slane %v1364_v44, 1  ;;  %v1430_v53 = vrot.slane %v1384_v45, 1  ;;  %v1516_v44 = vld [vmem:[#allocation17 + $0x30] sm:$0xff] }
 0x6ce   :  { %1494 = vmatpush.msrb.mxu3 %v1479_v36 }
 0x6cf   :  { %v1409_v57 = vadd.f32 %v1407_v15, %v2897_v25  ;;  %v1432_v0 = vadd.f32 %v1430_v53, %v2899_v40  ;;  %v1476_v40 = vld [vmem:[#allocation15 + $0x38] sm:$0xff]  ;;  %v1515_v15 = vld [vmem:[#allocation17 + $0x28] sm:$0xff] }
 0x6d0   :  { %1495 = vmatpush.msrb.mxu3 %v1478_v9 }
 0x6d1   :  { %v1614_v28 = vmul.f32 -1.442695, %v1409_v57  ;;  %v1615_v52 = vmul.f32 -1.442695, %v1432_v0  ;;  %v1403_v60 = vpop.f32.mrf.mxu2 }
 0x6d2   :  { %1496 = vmatpush.msrb.mxu3 %v1477_v17  ;;  %v1404_v55 = vadd.f32 %v1403_v60, %v2900_v62  ;;  %v1523_v62 = vld [vmem:[#allocation17 + $0x68] sm:$0xff]  ;;  %v1550_v17 = vlaneseq }
 0x6d3   :  { %1706 = vpow2.f32 %v1614_v28  ;;  %1532 = vmatpush.msrb.mxu0 %v1523_v62  ;;  %v1513_v28 = vld [vmem:[#allocation17 + $0x18] sm:$0xff] }
 0x6d4   :  { %1708 = vpow2.f32 %v1615_v52  ;;  %1497 = vmatpush.msrb.mxu3 %v1476_v40  ;;  %v1453_v23 = vrot.slane %v1404_v55, 1  ;;  %v1512_v52 = vld [vmem:[#allocation17 + $0x10] sm:$0xff] }
 0x6d5   :  { %1533 = vmatpush.msrb.mxu0 %v1522_v21 }
 0x6d6   :  { %1498 = vmatpush.msrb.mxu3 %v1475_v63 }
 0x6d7   :  { %1534 = vmatpush.msrb.mxu0 %v1521_v5 }
 0x6d8   :  { %1499 = vmatpush.msrb.mxu3 %v1474_v20 }
 0x6d9   :  { %v1707_v58 = vpop.eup %1706  ;;  %1535 = vmatpush.msrb.mxu0 %v1520_v35 }
 0x6da   :  { %v1709_v18 = vpop.eup %1708  ;;  %v1413_v25 = vadd.f32 1.0, %v1707_v58  ;;  %1500 = vmatpush.msrb.mxu3 %v1473_v48 }
 0x6db   :  { %v2812_v19 = vadd.f32 1.0, %v1709_v18  ;;  %1536 = vmatpush.msrb.mxu0 %v1519_v37  ;;  %v1551_v18 = vand.u32 127, %v1550_v17 }
 0x6dc   :  { %1710 = vrcp.f32 %v1413_v25  ;;  %1501 = vmatpush.msrb.mxu3 %v1472_v38  ;;  %v1425_v31 = vand.u32 2147483648, %v1413_v25  ;;  %v1423_v54 = vand.u32 2147483647, %v1413_v25  ;;  %vm1419_vm10 = vweird.f32 %v1413_v25 }
 0x6dd   :  { %1712 = vrcp.f32 %v2812_v19  ;;  %v1448_v51 = vand.u32 2147483648, %v2812_v19  ;;  %vm1442_vm14 = vweird.f32 %v2812_v19  ;;  %1537 = vmatpush.msrb.mxu0 %v1518_v43  ;;  %vm1552_vm1 = vcmp.lt.s32.totalorder %v1551_v18, 4 }
 0x6de   :  { %1502 = vmatpush.msrb.mxu3 %v1471_v6  ;;  %v1426_v12 = vor.u32 1.1754944e-38, %v1425_v31  ;;  %vm1424_vm12 = vcmp.eq.f32.partialorder %v1423_v54, 8.507059e+37 }
 0x6df   :  { %v1449_v45 = vor.u32 1.1754944e-38, %v1448_v51  ;;  %1538 = vmatpush.msrb.mxu0 %v1517_v8 }
 0x6e0   :  { %1503 = vmatpush.msrb.mxu3 %v1470_v16 }
 0x6e1   :  { %1539 = vmatpush.msrb.mxu0 %v1516_v44 }
 0x6e2   :  { %v1711_v22 = vpop.eup %1710  ;;  %1504 = vmatpush.msrb.mxu3 %v1469_v1 }
 0x6e3   :  { %v1415_v10 = vmul.f32 %v1711_v22, %v1413_v25  ;;  %v1713_v42 = vpop.eup %1712  ;;  %vm1420_vm9 = vweird.f32 %v1711_v22  ;;  %1540 = vmatpush.msrb.mxu0 %v1515_v15  ;;  %v1635_v25 = vld [vmem:[%s2843_s12] ss:$0 sm:$0xff]  ;;  %s1582_s12 = sshll.u32 %s2038_s10, 4  ;;  %s1583_s12 = int_to_ptr.vmem [resolvable:$true] %s1582_s12 }
 0x6e4   :  { %v1438_v7 = vmul.f32 %v1713_v42, %v2812_v19  ;;  %vm1421_vm11 = vmor %vm1419_vm10, %vm1420_vm9  ;;  %vm1443_vm13 = vweird.f32 %v1713_v42 }
 0x6e5   :  { %v1416_v2 = vsub.f32 1.0, %v1415_v10  ;;  %vm1444_vm15 = vmor %vm1442_vm14, %vm1443_vm13  ;;  %1541 = vmatpush.msrb.mxu0 %v1514_v49 }
 0x6e6   :  { %v1439_v26 = vsub.f32 1.0, %v1438_v7 }
 0x6e7   :  { %v1417_v41 = vmul.f32 %v1711_v22, %v1416_v2  ;;  %1542 = vmatpush.msrb.mxu0 %v1513_v28 }
 0x6e8   :  { %v1440_v34 = vmul.f32 %v1713_v42, %v1439_v26 }
 0x6e9   :  { %v1418_v29 = vadd.f32 %v1711_v22, %v1417_v41  ;;  %1543 = vmatpush.msrb.mxu0 %v1512_v52 }
 0x6ea   :  { %v1441_v39 = vadd.f32 %v1713_v42, %v1440_v34 }
 0x6eb   :  { %v1422_v4 = vsel %vm1421_vm11, %v1711_v22, %v1418_v29 }
 0x6ec   :  { %v1427_v3 = vsel %vm1424_vm12, %v1426_v12, %v1422_v4  ;;  %v1445_v27 = vsel %vm1444_vm15, %v1713_v42, %v1441_v39 }
 0x6ed   :  { %v1455_v24 = vmul.f32 %v1453_v23, %v1427_v3 }
 0x6ef   :  { %v1456_v32 = vadd.f32 %v1455_v24, %v2449_v50  ;;  %v1446_v50 = vand.u32 2147483647, %v2812_v19 }
 0x6f1   :  { %1714 = vtanh.f32 %v1456_v32  ;;  %vm1447_vm0 = vcmp.eq.f32.partialorder %v1446_v50, 8.507059e+37 }
 0x6f2   :  { %v1450_v53 = vsel %vm1447_vm0, %v1449_v45, %v1445_v27 }
 0x6f7   :  { %v1715_v46 = vpop.eup %1714 }
 0x6f8   :  { %v1459_v56 = vrot.slane %v1715_v46, 1 }
 0x6fa   :  { %v1461_v30 = vsub.f32 %v2804_v47, %v1459_v56  ;;  %v1511_v47 = vld [vmem:[#allocation17 + $0x8] sm:$0xff] }
 0x6fb   :  { %1544 = vmatpush.msrb.mxu0 %v1511_v47 }
 0x6fc   :  { %v1463_v13 = vrot.slane %v1461_v30, 7 }
 0x6fd   :  { %1545 = vmatpush.msrb.mxu0 %v1510_v61 }
 0x6fe   :  { %v1465_v59 = vmul.f32 %v1463_v13, %v1450_v53 }
 0x700   :  { %v1466_v57 = vadd.f32 %v1715_v46, %v1465_v59 }
 0x702   :  { %1467 = vst [vmem:[#allocation2] sm:$0x80] %v1466_v57 }
 0x709   :  { %v1468_v0 = vld [vmem:[#allocation2] sm:$0xff] }
 0x70a   :  { %1505 = vmatmul.f32.vlgmr.msrb.gmra.mxu3 %v1468_v0 }
 0x78d   :  { %v1506_v36 = vpop.f32.mrf.mxu3 }
 0x78e   :  { %v1507_v9 = vadd.f32 %v1634_v11, %v1506_v36 }
 0x790   :  { %1716 = vtanh.f32 %v1507_v9 }
 0x796   :  { %v1717_v58 = vpop.eup %1716 }
 0x797   :  { %1546 = vmatmul.f32.vlgmr.msrb.gmra.mxu0 %v1717_v58 }
 0x814   :  { %v1547_v40 = vpop.f32.mrf.mxu0 }
 0x815   :  { %v1548_v19 = vadd.f32 %v1635_v25, %v1547_v40 }
 0x817   :  { %v1553_v63 = vsel %vm1552_vm1, %v1548_v19, -1e+30 }
 0x818   :  { %1554 = vmax.xlane.f32.xlu0 %v1553_v63 }
 0x88b   :  { %v1555_v20 = vpop.xlane.xlu0 %1554 }
 0x88c   :  { %v1556_v48 = vsub.f32 %v1553_v63, %v1555_v20 }
 0x88e   :  { %v1557_v22 = vmul.f32 1.442695, %v1556_v48 }
 0x890   :  { %1718 = vpow2.f32 %v1557_v22 }
 0x896   :  { %v1719_v38 = vpop.eup %1718 }
 0x897   :  { %1559 = vadd.xlane.f32.xlu0 %v1719_v38 }
 0x90a   :  { %v1560_v10 = vpop.xlane.xlu0 %1559 }
 0x90b   :  { %1720 = vrcp.f32 %v1560_v10  ;;  %v1572_v16 = vand.u32 2147483648, %v1560_v10  ;;  %v1570_v42 = vand.u32 2147483647, %v1560_v10  ;;  %vm1566_vm3 = vweird.f32 %v1560_v10 }
 0x90d   :  { %v1573_v41 = vor.u32 1.1754944e-38, %v1572_v16  ;;  %vm1571_vm5 = vcmp.eq.f32.partialorder %v1570_v42, 8.507059e+37 }
 0x911   :  { %v1721_v6 = vpop.eup %1720 }
 0x912   :  { %v1562_v60 = vmul.f32 %v1721_v6, %v1560_v10  ;;  %vm1567_vm2 = vweird.f32 %v1721_v6 }
 0x913   :  { %vm1568_vm4 = vmor %vm1566_vm3, %vm1567_vm2 }
 0x914   :  { %v1563_v2 = vsub.f32 1.0, %v1562_v60 }
 0x916   :  { %v1564_v31 = vmul.f32 %v1721_v6, %v1563_v2 }
 0x918   :  { %v1565_v55 = vadd.f32 %v1721_v6, %v1564_v31 }
 0x91a   :  { %v1569_v54 = vsel %vm1568_vm4, %v1721_v6, %v1565_v55 }
 0x91b   :  { %v1574_v1 = vsel %vm1571_vm5, %v1573_v41, %v1569_v54 }
 0x91c   :  { %v1575_v29 = vmul.f32 %v1719_v38, %v1574_v1 }
 0x91e   :  { %1576 = vst [vmem:[#allocation18] sm:$0xff] %v1575_v29 }
 0x91f   :  { %1587 = dma.vmem_to_hbm [thread:$0]  %s1583_s12, 128, %s1585_s1, [#allocation5]  }
 0x920   :  { %2020 = dma.done.wait [#allocation5], 128  }
 0x921   :  { %2021 = vsyncadd [#allocation5], 4294967168 }
 0x922   :  { %1592 = vsyncpa [#allocation4], 1 }
 0x923   :  { %1593 = vsyncpa [#allocation7], 1 }
 0x924   :  { %1594 = vsyncpa [#allocation10], 1 }
 0x925   :  { %1595 = vsyncpa [#allocation13], 1 }
 0x926   :  { %1596 = vsyncpa [#allocation16], 1 }
 0x927   :  { %1597 = vsyncpa [#allocation5], 1 }

</bundles_post_ra>
